<compile_context>
chip_gen: v7x
topology: tpu7x:2x2x1
jax: 0.10.0
libtpu: 0.0.40
codegen_flags: <defaults>
</compile_context>

<pallas_src>
import functools
import math

import jax
import jax.numpy as jnp
from jax import lax
from jax.experimental import pallas as pl
from jax.experimental.pallas import tpu as pltpu

# ---- module constants (mirroring the PyTorch file) -------------------------
CNN_FC_LSTM_lstm_hidden_size = 65
CNN_FC_LSTM_num_lstm_layers = 2   # fixed at 2 in the fused kernel below
headLinearlayers = 3
poolinglayer = 2
CNN_OUTPUT_SIZE = 65

LANE = 128   # TPU lane width
SUB = 8      # TPU sublane granularity (f32)

_VMEM = pl.BlockSpec(memory_space=pltpu.MemorySpace.VMEM)


def _rup(n, m):
    return ((n + m - 1) // m) * m


# ============================ fused Pallas kernel ============================

def _fused_kernel(patches_ref,
                  bb_w_ref, bb_b_ref, conv_w_ref, conv_b_ref,
                  fc1_w_ref, fc1_b_ref, fc2_w_ref, fc2_b_ref,
                  fc3_w_ref, fc3_b_ref, fc4_w_ref, fc4_b_ref,
                  wih0_ref, whh0_ref, b0_ref, w1_ref, b1_ref,
                  out_w_ref, out_b_ref,
                  o_ref,
                  pooled_ref, xp_ref,
                  *, s_per_block, n_img, T, B_pad, HP):
    """Post-im2col forward pass, tiled over spatial row-blocks of `patches`.

    Row layout of patches: row = spatial_idx * n_img + img, img = t * B_pad + b,
    so each LSTM timestep downstream is an aligned contiguous 8-row block.
    """
    f32 = jnp.float32

    def mm(a, b):
        return jnp.dot(a, b, preferred_element_type=f32)

    sb = pl.program_id(0)

    # ---- init max-pool accumulator (conv output can be negative -> -inf) ----
    @pl.when(sb == 0)
    def _init():
        pooled_ref[...] = jnp.full(pooled_ref.shape, -jnp.inf, dtype=f32)

    # ---- backbone stand-in (strided 3x3 conv via im2col) + ReLU, bf16 MXU ---
    feat = jnp.maximum(mm(patches_ref[...], bb_w_ref[...]) + bb_b_ref[...], 0.0)

    # ---- 1x1 conv fused with running AdaptiveMaxPool2d((1,1)) ---------------
    conv = mm(feat.astype(jnp.bfloat16), conv_w_ref[...]) + conv_b_ref[...]
    acc = pooled_ref[...]
    for ss in range(s_per_block):                 # small static unroll (VPU max)
        acc = jnp.maximum(acc, conv[ss * n_img:(ss + 1) * n_img, :])
    pooled_ref[...] = acc

    # ---- tail: FC head + 2-layer LSTM + fc_out, only on the last block ------
    @pl.when(sb == pl.num_programs(0) - 1)
    def _tail():
        pooled = pooled_ref[...]
        h = jnp.maximum(mm(pooled, fc1_w_ref[...]) + fc1_b_ref[...], 0.0)
        h = jnp.maximum(mm(h, fc2_w_ref[...]) + fc2_b_ref[...], 0.0)
        h = jnp.maximum(mm(h, fc3_w_ref[...]) + fc3_b_ref[...], 0.0)
        fea = mm(h, fc4_w_ref[...]) + fc4_b_ref[...]          # (n_img, CNNp)

        # LSTM layer-0 input projection hoisted out of the recurrence.
        xp_ref[...] = mm(fea, wih0_ref[...]) + b0_ref[...]    # (n_img, 4*HP)

        def gates(g):
            # padded gate order (i, f, o, g): one contiguous sigmoid + one tanh
            sig = jax.nn.sigmoid(g[:, 0:3 * HP])
            return (sig[:, 0:HP], sig[:, HP:2 * HP], sig[:, 2 * HP:3 * HP],
                    jnp.tanh(g[:, 3 * HP:4 * HP]))

        def step(t, carry):
            h0, c0, h1, c1 = carry
            row = pl.multiple_of(t * B_pad, B_pad)
            # refs loaded at use sites -> low vreg pressure in the serial loop
            g0 = xp_ref[pl.ds(row, B_pad), :] + mm(h0, whh0_ref[...])
            i0, f0, o0, gg0 = gates(g0)
            c0 = f0 * c0 + i0 * gg0
            h0 = o0 * jnp.tanh(c0)
            # layer-1: single fused [x ; h] projection (one MXU K=2*HP pass)
            g1 = mm(jnp.concatenate([h0, h1], axis=1), w1_ref[...]) + b1_ref[...]
            i1, f1, o1, gg1 = gates(g1)
            c1 = f1 * c1 + i1 * gg1
            h1 = o1 * jnp.tanh(c1)
            return h0, c0, h1, c1

        z = jnp.zeros((B_pad, HP), f32)
        _, _, h1, _ = lax.fori_loop(0, T, step, (z, z, z, z))

        # fc_out: ReLU then Linear(H -> anchors*2+1)
        o_ref[...] = mm(jnp.maximum(h1, 0.0), out_w_ref[...]) + out_b_ref[...]


# ============================ plain-JAX glue =================================

def im2col_3x3_spatial_major(x_nchw, stride):
    """3x3 patches (padding=1, given stride) -> (Hp*Wp*N, C*9), spatial-major rows."""
    N, C, H, W = x_nchw.shape
    xp = jnp.pad(x_nchw, ((0, 0), (0, 0), (1, 1), (1, 1)))
    Hp = math.ceil(H / stride)
    Wp = math.ceil(W / stride)
    rows = []
    for oh in range(Hp):
        for ow in range(Wp):
            patch = xp[:, :, oh * stride:oh * stride + 3,
                             ow * stride:ow * stride + 3]       # (N, C, 3, 3)
            rows.append(patch.reshape(N, C * 9))
    cols = jnp.stack(rows, axis=0)                              # (Hp*Wp, N, C*9)
    return cols.reshape(Hp * Wp * N, C * 9), Hp, Wp


def init_params(key, *, in_ch, backbone_out_ch, reduction, input_hw,
                pool_channels, fc_hidden_size, anchors):
    """Synthetic weights in PyTorch-equivalent shapes, padded to the lane-dense
    layout.  Backbone/conv weights are bf16 (f32 accumulation in-kernel)."""
    Hf = math.ceil(input_hw[0] / reduction)
    Wf = math.ceil(input_hw[1] / reduction)
    num_channels = pool_channels * Hf * Wf
    d1 = int(fc_hidden_size * 1.75)
    d2 = int(fc_hidden_size * 1.25)
    d3 = fc_hidden_size
    H = CNN_FC_LSTM_lstm_hidden_size
    out_dim = anchors * 2 + 1

    def nrm(k, shape, scale=0.1):
        return scale * jax.random.normal(k, shape, jnp.float32)

    ks = iter(jax.random.split(key, 24))

    def pad2(a, rp, cp):
        return jnp.pad(a, ((0, rp - a.shape[0]), (0, cp - a.shape[1])))

    Kp = _rup(in_ch * 9, 16)          # narrow K (27 -> 32), NOT 128: ~4x less HBM
    Cbp = _rup(backbone_out_ch, LANE)
    NCp = _rup(num_channels, LANE)
    D1p, D2p, D3p = _rup(d1, LANE), _rup(d2, LANE), _rup(d3, LANE)
    CNNp = _rup(CNN_OUTPUT_SIZE, LANE)
    HP = _rup(H, LANE)
    OUTp = _rup(out_dim, LANE)

    def pad_gate(w, rp):
        # PyTorch gate order along 4H is (i, f, g, o); we store (i, f, o, g),
        # each gate in its own 128-lane block (lane-aligned zero-cost views).
        blocks = [pad2(w[:, k * H:(k + 1) * H], rp, HP) for k in (0, 1, 3, 2)]
        return jnp.concatenate(blocks, axis=1)

    wih1 = pad_gate(nrm(next(ks), (H, 4 * H)), HP)
    whh1 = pad_gate(nrm(next(ks), (H, 4 * H)), HP)

    p = {
        # backbone stand-in: 3x3 conv, stride=reduction, pad=1, + ReLU (bf16)
        "bb_w": pad2(nrm(next(ks), (in_ch * 9, backbone_out_ch)), Kp, Cbp).astype(jnp.bfloat16),
        "bb_b": pad2(nrm(next(ks), (1, backbone_out_ch)), 1, Cbp),
        # 1x1 conv (poolinglayer == 2 path) (bf16)
        "conv_w": pad2(nrm(next(ks), (backbone_out_ch, num_channels)), Cbp, NCp).astype(jnp.bfloat16),
        "conv_b": pad2(nrm(next(ks), (1, num_channels)), 1, NCp),
        # fc head (headLinearlayers == 3)
        "fc1_w": pad2(nrm(next(ks), (num_channels, d1)), NCp, D1p),
        "fc1_b": pad2(nrm(next(ks), (1, d1)), 1, D1p),
        "fc2_w": pad2(nrm(next(ks), (d1, d2)), D1p, D2p),
        "fc2_b": pad2(nrm(next(ks), (1, d2)), 1, D2p),
        "fc3_w": pad2(nrm(next(ks), (d2, d3)), D2p, D3p),
        "fc3_b": pad2(nrm(next(ks), (1, d3)), 1, D3p),
        "fc4_w": pad2(nrm(next(ks), (d3, CNN_OUTPUT_SIZE)), D3p, CNNp),
        "fc4_b": pad2(nrm(next(ks), (1, CNN_OUTPUT_SIZE)), 1, CNNp),
        # 2-layer LSTM; weights pre-transposed to (in, 4H); bias = b_ih + b_hh
        "wih0": pad_gate(nrm(next(ks), (CNN_OUTPUT_SIZE, 4 * H)), CNNp),
        "whh0": pad_gate(nrm(next(ks), (H, 4 * H)), HP),
        "b0":   pad_gate(nrm(next(ks), (1, 4 * H)), 1),
        # layer-1: stacked [wih1 ; whh1] for the fused [h0 ; h1] matmul
        "w1":   jnp.concatenate([wih1, whh1], axis=0),          # (2*HP, 4*HP)
        "b1":   pad_gate(nrm(next(ks), (1, 4 * H)), 1),
        # fc_out: ReLU + Linear(H -> anchors*2+1)
        "out_w": pad2(nrm(next(ks), (H, out_dim)), HP, OUTp),
        "out_b": pad2(nrm(next(ks), (1, out_dim)), 1, OUTp),
    }

    # Padded-lane correctness is an invariant (sigmoid(0)=0.5 in padded gate
    # lanes is only neutral because padded weight rows/cols are exactly zero).
    def _check_gate_pad(w, true_rows):
        assert float(jnp.abs(w[true_rows:, :]).sum()) == 0.0
        for k in range(4):
            assert float(jnp.abs(w[:, k * HP + H:(k + 1) * HP]).sum()) == 0.0
    _check_gate_pad(p["wih0"], CNN_OUTPUT_SIZE)
    _check_gate_pad(p["whh0"], H)
    _check_gate_pad(p["b0"], 1)
    _check_gate_pad(p["b1"], 1)
    assert float(jnp.abs(p["w1"][H:HP, :]).sum()) == 0.0
    assert float(jnp.abs(p["w1"][HP + H:, :]).sum()) == 0.0
    for k in range(4):
        assert float(jnp.abs(p["w1"][:, k * HP + H:(k + 1) * HP]).sum()) == 0.0
    assert float(jnp.abs(p["out_w"][H:, :]).sum()) == 0.0
    assert float(jnp.abs(p["out_w"][:, out_dim:]).sum()) == 0.0

    return p, num_channels


def forward(x, p, *, reduction, anchors, block_rows_target=512):
    """x: (B, T, C, H, W) float32 (NCHW per frame). Returns (B, anchors*2+1)."""
    B, T, C, H, W = x.shape
    out_dim = anchors * 2 + 1
    B_pad = _rup(B, SUB)

    # frames ordered (t, b), batch padded to the sublane granularity so each
    # LSTM timestep maps to a sublane-aligned contiguous row block downstream.
    xt = jnp.transpose(x, (1, 0, 2, 3, 4))                      # (T, B, C, H, W)
    xt = jnp.pad(xt, ((0, 0), (0, B_pad - B), (0, 0), (0, 0), (0, 0)))
    xf = xt.reshape(T * B_pad, C, H, W)

    # TODO(synk): form the im2col in-kernel from raw NCHW frames at production
    # sizes to avoid the 9x expansion pass entirely.
    patches, Hf, Wf = im2col_3x3_spatial_major(xf, reduction)   # (hw*n_img, C*9)
    Kp = p["bb_w"].shape[0]                                     # narrow K (e.g. 32)
    patches = jnp.pad(patches, ((0, 0), (0, Kp - patches.shape[1])))
    patches = patches.astype(jnp.bfloat16)                      # halve DMA bytes

    n_img = T * B_pad
    hw = Hf * Wf
    HP = p["whh0"].shape[0]
    NCp = p["conv_w"].shape[1]
    OUTp = p["out_w"].shape[1]

    # spatial row-block size: a multiple of n_img that divides hw*n_img and is
    # <= block_rows_target (use 512-1024 rows, multiple of 256 on v6e/v7x, at
    # production sizes; bounded so 2 buffered blocks + weights fit v7x VMEM).
    s_per_block = 1
    for d in range(1, hw + 1):
        if hw % d == 0 and d * n_img <= max(n_img, block_rows_target):
            s_per_block = d
    rows_per_block = s_per_block * n_img
    nblocks = hw // s_per_block

    kernel = functools.partial(_fused_kernel, s_per_block=s_per_block,
                               n_img=n_img, T=T, B_pad=B_pad, HP=HP)

    weights = (p["bb_w"], p["bb_b"], p["conv_w"], p["conv_b"],
               p["fc1_w"], p["fc1_b"], p["fc2_w"], p["fc2_b"],
               p["fc3_w"], p["fc3_b"], p["fc4_w"], p["fc4_b"],
               p["wih0"], p["whh0"], p["b0"], p["w1"], p["b1"],
               p["out_w"], p["out_b"])

    # advisory cost estimate for XLA's scheduler
    flops = int(2 * hw * n_img * (Kp * p["bb_w"].shape[1] + p["conv_w"].shape[0] * NCp)
                + 2 * n_img * (NCp * p["fc1_w"].shape[1]
                               + p["fc2_w"].shape[0] * p["fc2_w"].shape[1]
                               + p["fc3_w"].shape[0] * p["fc3_w"].shape[1]
                               + p["fc4_w"].shape[0] * p["fc4_w"].shape[1]
                               + p["wih0"].shape[0] * 4 * HP)
                + 2 * T * B_pad * (HP * 4 * HP + 2 * HP * 4 * HP)
                + 2 * B_pad * HP * OUTp)
    bytes_accessed = int(patches.size * patches.dtype.itemsize
                         + sum(int(w.size) * w.dtype.itemsize for w in weights)
                         + B_pad * OUTp * 4)
    transcendentals = int(2 * T * B_pad * 5 * HP)

    out_pad = pl.pallas_call(
        kernel,
        out_shape=jax.ShapeDtypeStruct((B_pad, OUTp), jnp.float32),
        grid=(nblocks,),
        in_specs=[pl.BlockSpec((rows_per_block, Kp), lambda s: (s, 0))]
                 + [_VMEM] * 19,
        out_specs=pl.BlockSpec((B_pad, OUTp), lambda s: (0, 0)),
        scratch_shapes=[pltpu.VMEM((n_img, NCp), jnp.float32),     # pooled max
                        pltpu.VMEM((n_img, 4 * HP), jnp.float32)], # LSTM xproj0
        compiler_params=pltpu.CompilerParams(
            dimension_semantics=("arbitrary",),   # spatial axis is a max-reduction
            vmem_limit_bytes=32 * 1024 * 1024),
        cost_estimate=pl.CostEstimate(flops=flops,
                                      transcendentals=transcendentals,
                                      bytes_accessed=bytes_accessed),
    )(patches, *weights)

    # strip lane / sublane padding outside the kernel
    return out_pad[:B, :out_dim]


# ================================ main =======================================

if __name__ == "__main__":
    B, T = 2, 4
    C, H, W = 3, 16, 16
    reduction = 8            # backbone reduction factor
    backbone_out_ch = 8      # backbone.out_channels[-1]
    pool_channels = 4
    fc_hidden_size = 32
    anchors = 8

    key = jax.random.PRNGKey(0)
    pkey, xkey = jax.random.split(key)
    params, num_channels = init_params(
        pkey, in_ch=C, backbone_out_ch=backbone_out_ch, reduction=reduction,
        input_hw=(H, W), pool_channels=pool_channels,
        fc_hidden_size=fc_hidden_size, anchors=anchors)

    x = jax.random.normal(xkey, (B, T, C, H, W), jnp.float32)

    # block_rows_target=64 -> a 2-step grid at these toy shapes (exercises the
    # pooled-accumulator init / tail path); use 512-1024 at production sizes.
    fwd = jax.jit(functools.partial(forward, reduction=reduction,
                                    anchors=anchors, block_rows_target=64))
    out = jax.block_until_ready(fwd(x, params))

    assert out.shape == (B, anchors * 2 + 1), out.shape
    assert bool(jnp.all(jnp.isfinite(out)))
    print("KERNEL_OK")
</pallas_src>

<mosaic_0001>
module attributes {stable_mosaic.version = 11 : i64} {
  func.func @_fused_kernel(%arg0: i32, %arg1: memref<64x32xbf16, #tpu.memory_space<vmem>>, %arg2: memref<32x128xbf16, #tpu.memory_space<vmem>>, %arg3: memref<1x128xf32, #tpu.memory_space<vmem>>, %arg4: memref<128x128xbf16, #tpu.memory_space<vmem>>, %arg5: memref<1x128xf32, #tpu.memory_space<vmem>>, %arg6: memref<128x128xf32, #tpu.memory_space<vmem>>, %arg7: memref<1x128xf32, #tpu.memory_space<vmem>>, %arg8: memref<128x128xf32, #tpu.memory_space<vmem>>, %arg9: memref<1x128xf32, #tpu.memory_space<vmem>>, %arg10: memref<128x128xf32, #tpu.memory_space<vmem>>, %arg11: memref<1x128xf32, #tpu.memory_space<vmem>>, %arg12: memref<128x128xf32, #tpu.memory_space<vmem>>, %arg13: memref<1x128xf32, #tpu.memory_space<vmem>>, %arg14: memref<128x512xf32, #tpu.memory_space<vmem>>, %arg15: memref<128x512xf32, #tpu.memory_space<vmem>>, %arg16: memref<1x512xf32, #tpu.memory_space<vmem>>, %arg17: memref<256x512xf32, #tpu.memory_space<vmem>>, %arg18: memref<1x512xf32, #tpu.memory_space<vmem>>, %arg19: memref<128x128xf32, #tpu.memory_space<vmem>>, %arg20: memref<1x128xf32, #tpu.memory_space<vmem>>, %arg21: memref<8x128xf32, #tpu.memory_space<vmem>>, %arg22: memref<32x128xf32, #tpu.memory_space<vmem>>, %arg23: memref<32x512xf32, #tpu.memory_space<vmem>>) attributes {dimension_semantics = [#tpu.dimension_semantics<arbitrary>], iteration_bounds = array<i64: 2>, scalar_prefetch = 0 : i64, scratch_operands = 2 : i64, tpu.core_type = #tpu.core_type<tc>, window_params = [{transform_indices = @transform_0, window_bounds = array<i64: 64, 32>}, {pipeline_mode = #tpu.pipeline_mode<synchronous>, transform_indices = @transform_1, window_bounds = array<i64: 32, 128>}, {pipeline_mode = #tpu.pipeline_mode<synchronous>, transform_indices = @transform_2, window_bounds = array<i64: 1, 128>}, {pipeline_mode = #tpu.pipeline_mode<synchronous>, transform_indices = @transform_3, window_bounds = array<i64: 128, 128>}, {pipeline_mode = #tpu.pipeline_mode<synchronous>, transform_indices = @transform_4, window_bounds = array<i64: 1, 128>}, {pipeline_mode = #tpu.pipeline_mode<synchronous>, transform_indices = @transform_5, window_bounds = array<i64: 128, 128>}, {pipeline_mode = #tpu.pipeline_mode<synchronous>, transform_indices = @transform_6, window_bounds = array<i64: 1, 128>}, {pipeline_mode = #tpu.pipeline_mode<synchronous>, transform_indices = @transform_7, window_bounds = array<i64: 128, 128>}, {pipeline_mode = #tpu.pipeline_mode<synchronous>, transform_indices = @transform_8, window_bounds = array<i64: 1, 128>}, {pipeline_mode = #tpu.pipeline_mode<synchronous>, transform_indices = @transform_9, window_bounds = array<i64: 128, 128>}, {pipeline_mode = #tpu.pipeline_mode<synchronous>, transform_indices = @transform_10, window_bounds = array<i64: 1, 128>}, {pipeline_mode = #tpu.pipeline_mode<synchronous>, transform_indices = @transform_11, window_bounds = array<i64: 128, 128>}, {pipeline_mode = #tpu.pipeline_mode<synchronous>, transform_indices = @transform_12, window_bounds = array<i64: 1, 128>}, {pipeline_mode = #tpu.pipeline_mode<synchronous>, transform_indices = @transform_13, window_bounds = array<i64: 128, 512>}, {pipeline_mode = #tpu.pipeline_mode<synchronous>, transform_indices = @transform_14, window_bounds = array<i64: 128, 512>}, {pipeline_mode = #tpu.pipeline_mode<synchronous>, transform_indices = @transform_15, window_bounds = array<i64: 1, 512>}, {pipeline_mode = #tpu.pipeline_mode<synchronous>, transform_indices = @transform_16, window_bounds = array<i64: 256, 512>}, {pipeline_mode = #tpu.pipeline_mode<synchronous>, transform_indices = @transform_17, window_bounds = array<i64: 1, 512>}, {pipeline_mode = #tpu.pipeline_mode<synchronous>, transform_indices = @transform_18, window_bounds = array<i64: 128, 128>}, {pipeline_mode = #tpu.pipeline_mode<synchronous>, transform_indices = @transform_19, window_bounds = array<i64: 1, 128>}, {pipeline_mode = #tpu.pipeline_mode<synchronous>, transform_indices = @transform_20, window_bounds = array<i64: 8, 128>}]} {
    %c0_i32 = arith.constant 0 : i32
    %0 = arith.cmpi eq, %arg0, %c0_i32 : i32
    %1 = arith.extui %0 : i1 to i32
    %c0_i32_0 = arith.constant 0 : i32
    %2 = arith.cmpi ne, %1, %c0_i32_0 : i32
    scf.if %2 {
      %cst_17 = arith.constant 0xFF800000 : f32
      %26 = vector.broadcast %cst_17 : f32 to vector<32x128xf32>
      %c0_18 = arith.constant 0 : index
      %c0_19 = arith.constant 0 : index
      %27 = vector.load %arg22[%c0_18, %c0_19] : memref<32x128xf32, #tpu.memory_space<vmem>>, vector<32x128xf32>
      tpu.vector_store %arg22[%c0_18, %c0_19], %26 {strides = array<i32>} : memref<32x128xf32, #tpu.memory_space<vmem>>, vector<32x128xf32>,
    } else {
    }
    %c0 = arith.constant 0 : index
    %c0_1 = arith.constant 0 : index
    %3 = vector.load %arg1[%c0, %c0_1] : memref<64x32xbf16, #tpu.memory_space<vmem>>, vector<64x32xbf16>
    %c0_2 = arith.constant 0 : index
    %c0_3 = arith.constant 0 : index
    %4 = vector.load %arg2[%c0_2, %c0_3] : memref<32x128xbf16, #tpu.memory_space<vmem>>, vector<32x128xbf16>
    %cst = arith.constant dense<0.000000e+00> : vector<64x128xf32>
    %5 = tpu.matmul %3, %4, %cst {dimension_numbers = #tpu.dot_dimension_numbers<[1], [0], [0], [1], [0, 0, 1, 1], [], []>} : vector<64x32xbf16>, vector<32x128xbf16>, vector<64x128xf32> -> vector<64x128xf32>
    %c0_4 = arith.constant 0 : index
    %c0_5 = arith.constant 0 : index
    %6 = vector.load %arg3[%c0_4, %c0_5] : memref<1x128xf32, #tpu.memory_space<vmem>>, vector<1x128xf32>
    %7 = vector.broadcast %6 : vector<1x128xf32> to vector<64x128xf32>
    %8 = arith.addf %5, %7 : vector<64x128xf32>
    %cst_6 = arith.constant 0.000000e+00 : f32
    %9 = vector.broadcast %cst_6 : f32 to vector<64x128xf32>
    %10 = arith.maximumf %8, %9 : vector<64x128xf32>
    %11 = arith.truncf %10 : vector<64x128xf32> to vector<64x128xbf16>
    %c0_7 = arith.constant 0 : index
    %c0_8 = arith.constant 0 : index
    %12 = vector.load %arg4[%c0_7, %c0_8] : memref<128x128xbf16, #tpu.memory_space<vmem>>, vector<128x128xbf16>
    %cst_9 = arith.constant dense<0.000000e+00> : vector<64x128xf32>
    %13 = tpu.matmul %11, %12, %cst_9 {dimension_numbers = #tpu.dot_dimension_numbers<[1], [0], [0], [1], [0, 0, 1, 1], [], []>} : vector<64x128xbf16>, vector<128x128xbf16>, vector<64x128xf32> -> vector<64x128xf32>
    %c0_10 = arith.constant 0 : index
    %c0_11 = arith.constant 0 : index
    %14 = vector.load %arg5[%c0_10, %c0_11] : memref<1x128xf32, #tpu.memory_space<vmem>>, vector<1x128xf32>
    %15 = vector.broadcast %14 : vector<1x128xf32> to vector<64x128xf32>
    %16 = arith.addf %13, %15 : vector<64x128xf32>
    %c0_12 = arith.constant 0 : index
    %c0_13 = arith.constant 0 : index
    %17 = vector.load %arg22[%c0_12, %c0_13] : memref<32x128xf32, #tpu.memory_space<vmem>>, vector<32x128xf32>
    %18 = vector.extract_strided_slice %16 {offsets = [0, 0], sizes = [32, 128], strides = [1, 1]} : vector<64x128xf32> to vector<32x128xf32>
    %19 = arith.maximumf %17, %18 : vector<32x128xf32>
    %20 = vector.extract_strided_slice %16 {offsets = [32, 0], sizes = [32, 128], strides = [1, 1]} : vector<64x128xf32> to vector<32x128xf32>
    %21 = arith.maximumf %19, %20 : vector<32x128xf32>
    %c0_14 = arith.constant 0 : index
    %c0_15 = arith.constant 0 : index
    %22 = vector.load %arg22[%c0_14, %c0_15] : memref<32x128xf32, #tpu.memory_space<vmem>>, vector<32x128xf32>
    tpu.vector_store %arg22[%c0_14, %c0_15], %21 {strides = array<i32>} : memref<32x128xf32, #tpu.memory_space<vmem>>, vector<32x128xf32>,
    %c1_i32 = arith.constant 1 : i32
    %23 = arith.cmpi eq, %arg0, %c1_i32 : i32
    %24 = arith.extui %23 : i1 to i32
    %c0_i32_16 = arith.constant 0 : i32
    %25 = arith.cmpi ne, %24, %c0_i32_16 : i32
    scf.if %25 {
      %c0_17 = arith.constant 0 : index
      %c0_18 = arith.constant 0 : index
      %26 = vector.load %arg22[%c0_17, %c0_18] : memref<32x128xf32, #tpu.memory_space<vmem>>, vector<32x128xf32>
      %c0_19 = arith.constant 0 : index
      %c0_20 = arith.constant 0 : index
      %27 = vector.load %arg6[%c0_19, %c0_20] : memref<128x128xf32, #tpu.memory_space<vmem>>, vector<128x128xf32>
      %cst_21 = arith.constant dense<0.000000e+00> : vector<32x128xf32>
      %28 = tpu.matmul %26, %27, %cst_21 {dimension_numbers = #tpu.dot_dimension_numbers<[1], [0], [0], [1], [0, 0, 1, 1], [], []>} : vector<32x128xf32>, vector<128x128xf32>, vector<32x128xf32> -> vector<32x128xf32>
      %c0_22 = arith.constant 0 : index
      %c0_23 = arith.constant 0 : index
      %29 = vector.load %arg7[%c0_22, %c0_23] : memref<1x128xf32, #tpu.memory_space<vmem>>, vector<1x128xf32>
      %30 = vector.broadcast %29 : vector<1x128xf32> to vector<32x128xf32>
      %31 = arith.addf %28, %30 : vector<32x128xf32>
      %cst_24 = arith.constant 0.000000e+00 : f32
      %32 = vector.broadcast %cst_24 : f32 to vector<32x128xf32>
      %33 = arith.maximumf %31, %32 : vector<32x128xf32>
      %c0_25 = arith.constant 0 : index
      %c0_26 = arith.constant 0 : index
      %34 = vector.load %arg8[%c0_25, %c0_26] : memref<128x128xf32, #tpu.memory_space<vmem>>, vector<128x128xf32>
      %cst_27 = arith.constant dense<0.000000e+00> : vector<32x128xf32>
      %35 = tpu.matmul %33, %34, %cst_27 {dimension_numbers = #tpu.dot_dimension_numbers<[1], [0], [0], [1], [0, 0, 1, 1], [], []>} : vector<32x128xf32>, vector<128x128xf32>, vector<32x128xf32> -> vector<32x128xf32>
      %c0_28 = arith.constant 0 : index
      %c0_29 = arith.constant 0 : index
      %36 = vector.load %arg9[%c0_28, %c0_29] : memref<1x128xf32, #tpu.memory_space<vmem>>, vector<1x128xf32>
      %37 = vector.broadcast %36 : vector<1x128xf32> to vector<32x128xf32>
      %38 = arith.addf %35, %37 : vector<32x128xf32>
      %cst_30 = arith.constant 0.000000e+00 : f32
      %39 = vector.broadcast %cst_30 : f32 to vector<32x128xf32>
      %40 = arith.maximumf %38, %39 : vector<32x128xf32>
      %c0_31 = arith.constant 0 : index
      %c0_32 = arith.constant 0 : index
      %41 = vector.load %arg10[%c0_31, %c0_32] : memref<128x128xf32, #tpu.memory_space<vmem>>, vector<128x128xf32>
      %cst_33 = arith.constant dense<0.000000e+00> : vector<32x128xf32>
      %42 = tpu.matmul %40, %41, %cst_33 {dimension_numbers = #tpu.dot_dimension_numbers<[1], [0], [0], [1], [0, 0, 1, 1], [], []>} : vector<32x128xf32>, vector<128x128xf32>, vector<32x128xf32> -> vector<32x128xf32>
      %c0_34 = arith.constant 0 : index
      %c0_35 = arith.constant 0 : index
      %43 = vector.load %arg11[%c0_34, %c0_35] : memref<1x128xf32, #tpu.memory_space<vmem>>, vector<1x128xf32>
      %44 = vector.broadcast %43 : vector<1x128xf32> to vector<32x128xf32>
      %45 = arith.addf %42, %44 : vector<32x128xf32>
      %cst_36 = arith.constant 0.000000e+00 : f32
      %46 = vector.broadcast %cst_36 : f32 to vector<32x128xf32>
      %47 = arith.maximumf %45, %46 : vector<32x128xf32>
      %c0_37 = arith.constant 0 : index
      %c0_38 = arith.constant 0 : index
      %48 = vector.load %arg12[%c0_37, %c0_38] : memref<128x128xf32, #tpu.memory_space<vmem>>, vector<128x128xf32>
      %cst_39 = arith.constant dense<0.000000e+00> : vector<32x128xf32>
      %49 = tpu.matmul %47, %48, %cst_39 {dimension_numbers = #tpu.dot_dimension_numbers<[1], [0], [0], [1], [0, 0, 1, 1], [], []>} : vector<32x128xf32>, vector<128x128xf32>, vector<32x128xf32> -> vector<32x128xf32>
      %c0_40 = arith.constant 0 : index
      %c0_41 = arith.constant 0 : index
      %50 = vector.load %arg13[%c0_40, %c0_41] : memref<1x128xf32, #tpu.memory_space<vmem>>, vector<1x128xf32>
      %51 = vector.broadcast %50 : vector<1x128xf32> to vector<32x128xf32>
      %52 = arith.addf %49, %51 : vector<32x128xf32>
      %c0_42 = arith.constant 0 : index
      %c0_43 = arith.constant 0 : index
      %53 = vector.load %arg14[%c0_42, %c0_43] : memref<128x512xf32, #tpu.memory_space<vmem>>, vector<128x512xf32>
      %cst_44 = arith.constant dense<0.000000e+00> : vector<32x512xf32>
      %54 = tpu.matmul %52, %53, %cst_44 {dimension_numbers = #tpu.dot_dimension_numbers<[1], [0], [0], [1], [0, 0, 1, 1], [], []>} : vector<32x128xf32>, vector<128x512xf32>, vector<32x512xf32> -> vector<32x512xf32>
      %c0_45 = arith.constant 0 : index
      %c0_46 = arith.constant 0 : index
      %55 = vector.load %arg16[%c0_45, %c0_46] : memref<1x512xf32, #tpu.memory_space<vmem>>, vector<1x512xf32>
      %56 = vector.broadcast %55 : vector<1x512xf32> to vector<32x512xf32>
      %57 = arith.addf %54, %56 : vector<32x512xf32>
      %c0_47 = arith.constant 0 : index
      %c0_48 = arith.constant 0 : index
      %58 = vector.load %arg23[%c0_47, %c0_48] : memref<32x512xf32, #tpu.memory_space<vmem>>, vector<32x512xf32>
      tpu.vector_store %arg23[%c0_47, %c0_48], %57 {strides = array<i32>} : memref<32x512xf32, #tpu.memory_space<vmem>>, vector<32x512xf32>,
      %cst_49 = arith.constant 0.000000e+00 : f32
      %59 = vector.broadcast %cst_49 : f32 to vector<8x128xf32>
      %c0_i32_50 = arith.constant 0 : i32
      %c4_i32 = arith.constant 4 : i32
      %60 = arith.addi %c0_i32_50, %c4_i32 : i32
      %c1_i32_51 = arith.constant 1 : i32
      %61:4 = scf.for %arg24 = %c0_i32_50 to %60 step %c1_i32_51 iter_args(%arg25 = %59, %arg26 = %59, %arg27 = %59, %arg28 = %59) -> (vector<8x128xf32>, vector<8x128xf32>, vector<8x128xf32>, vector<8x128xf32>)  : i32 {
        %c8_i32 = arith.constant 8 : i32
        %70 = arith.muli %arg24, %c8_i32 : i32
        %71 = tpu.assume_multiple %70, 8 : i32
        %72 = arith.index_cast %71 : i32 to index
        %c0_61 = arith.constant 0 : index
        %73 = vector.load %arg23[%72, %c0_61] : memref<32x512xf32, #tpu.memory_space<vmem>>, vector<8x512xf32>
        %c0_62 = arith.constant 0 : index
        %c0_63 = arith.constant 0 : index
        %74 = vector.load %arg15[%c0_62, %c0_63] : memref<128x512xf32, #tpu.memory_space<vmem>>, vector<128x512xf32>
        %cst_64 = arith.constant dense<0.000000e+00> : vector<8x512xf32>
        %75 = tpu.matmul %arg25, %74, %cst_64 {dimension_numbers = #tpu.dot_dimension_numbers<[1], [0], [0], [1], [0, 0, 1, 1], [], []>} : vector<8x128xf32>, vector<128x512xf32>, vector<8x512xf32> -> vector<8x512xf32>
        %76 = arith.addf %73, %75 : vector<8x512xf32>
        %77 = vector.extract_strided_slice %76 {offsets = [0, 0], sizes = [8, 384], strides = [1, 1]} : vector<8x512xf32> to vector<8x384xf32>
        %78 = arith.negf %77 : vector<8x384xf32>
        %79 = math.exp %78 : vector<8x384xf32>
        %cst_65 = arith.constant 1.000000e+00 : f32
        %80 = vector.broadcast %cst_65 : f32 to vector<8x384xf32>
        %81 = arith.addf %80, %79 : vector<8x384xf32>
        %82 = arith.divf %80, %81 : vector<8x384xf32>
        %83 = vector.extract_strided_slice %82 {offsets = [0, 0], sizes = [8, 128], strides = [1, 1]} : vector<8x384xf32> to vector<8x128xf32>
        %84 = vector.extract_strided_slice %82 {offsets = [0, 128], sizes = [8, 128], strides = [1, 1]} : vector<8x384xf32> to vector<8x128xf32>
        %85 = vector.extract_strided_slice %82 {offsets = [0, 256], sizes = [8, 128], strides = [1, 1]} : vector<8x384xf32> to vector<8x128xf32>
        %86 = vector.extract_strided_slice %76 {offsets = [0, 384], sizes = [8, 128], strides = [1, 1]} : vector<8x512xf32> to vector<8x128xf32>
        %87 = math.tanh %86 : vector<8x128xf32>
        %88 = arith.mulf %84, %arg26 : vector<8x128xf32>
        %89 = arith.mulf %83, %87 : vector<8x128xf32>
        %90 = arith.addf %88, %89 : vector<8x128xf32>
        %91 = math.tanh %90 : vector<8x128xf32>
        %92 = arith.mulf %85, %91 : vector<8x128xf32>
        %93 = tpu.concatenate %92, %arg27 in 1 : vector<8x128xf32>, vector<8x128xf32> -> vector<8x256xf32>
        %c0_66 = arith.constant 0 : index
        %c0_67 = arith.constant 0 : index
        %94 = vector.load %arg17[%c0_66, %c0_67] : memref<256x512xf32, #tpu.memory_space<vmem>>, vector<256x512xf32>
        %cst_68 = arith.constant dense<0.000000e+00> : vector<8x512xf32>
        %95 = tpu.matmul %93, %94, %cst_68 {dimension_numbers = #tpu.dot_dimension_numbers<[1], [0], [0], [1], [0, 0, 1, 1], [], []>} : vector<8x256xf32>, vector<256x512xf32>, vector<8x512xf32> -> vector<8x512xf32>
        %c0_69 = arith.constant 0 : index
        %c0_70 = arith.constant 0 : index
        %96 = vector.load %arg18[%c0_69, %c0_70] : memref<1x512xf32, #tpu.memory_space<vmem>>, vector<1x512xf32>
        %97 = vector.broadcast %96 : vector<1x512xf32> to vector<8x512xf32>
        %98 = arith.addf %95, %97 : vector<8x512xf32>
        %99 = vector.extract_strided_slice %98 {offsets = [0, 0], sizes = [8, 384], strides = [1, 1]} : vector<8x512xf32> to vector<8x384xf32>
        %100 = arith.negf %99 : vector<8x384xf32>
        %101 = math.exp %100 : vector<8x384xf32>
        %cst_71 = arith.constant 1.000000e+00 : f32
        %102 = vector.broadcast %cst_71 : f32 to vector<8x384xf32>
        %103 = arith.addf %102, %101 : vector<8x384xf32>
        %104 = arith.divf %102, %103 : vector<8x384xf32>
        %105 = vector.extract_strided_slice %104 {offsets = [0, 0], sizes = [8, 128], strides = [1, 1]} : vector<8x384xf32> to vector<8x128xf32>
        %106 = vector.extract_strided_slice %104 {offsets = [0, 128], sizes = [8, 128], strides = [1, 1]} : vector<8x384xf32> to vector<8x128xf32>
        %107 = vector.extract_strided_slice %104 {offsets = [0, 256], sizes = [8, 128], strides = [1, 1]} : vector<8x384xf32> to vector<8x128xf32>
        %108 = vector.extract_strided_slice %98 {offsets = [0, 384], sizes = [8, 128], strides = [1, 1]} : vector<8x512xf32> to vector<8x128xf32>
        %109 = math.tanh %108 : vector<8x128xf32>
        %110 = arith.mulf %106, %arg28 : vector<8x128xf32>
        %111 = arith.mulf %105, %109 : vector<8x128xf32>
        %112 = arith.addf %110, %111 : vector<8x128xf32>
        %113 = math.tanh %112 : vector<8x128xf32>
        %114 = arith.mulf %107, %113 : vector<8x128xf32>
        scf.yield %92, %90, %114, %112 : vector<8x128xf32>, vector<8x128xf32>, vector<8x128xf32>, vector<8x128xf32>
      }
      %c4_i32_52 = arith.constant 4 : i32
      %cst_53 = arith.constant 0.000000e+00 : f32
      %62 = vector.broadcast %cst_53 : f32 to vector<8x128xf32>
      %63 = arith.maximumf %61#2, %62 : vector<8x128xf32>
      %c0_54 = arith.constant 0 : index
      %c0_55 = arith.constant 0 : index
      %64 = vector.load %arg19[%c0_54, %c0_55] : memref<128x128xf32, #tpu.memory_space<vmem>>, vector<128x128xf32>
      %cst_56 = arith.constant dense<0.000000e+00> : vector<8x128xf32>
      %65 = tpu.matmul %63, %64, %cst_56 {dimension_numbers = #tpu.dot_dimension_numbers<[1], [0], [0], [1], [0, 0, 1, 1], [], []>} : vector<8x128xf32>, vector<128x128xf32>, vector<8x128xf32> -> vector<8x128xf32>
      %c0_57 = arith.constant 0 : index
      %c0_58 = arith.constant 0 : index
      %66 = vector.load %arg20[%c0_57, %c0_58] : memref<1x128xf32, #tpu.memory_space<vmem>>, vector<1x128xf32>
      %67 = vector.broadcast %66 : vector<1x128xf32> to vector<8x128xf32>
      %68 = arith.addf %65, %67 : vector<8x128xf32>
      %c0_59 = arith.constant 0 : index
      %c0_60 = arith.constant 0 : index
      %69 = vector.load %arg21[%c0_59, %c0_60] : memref<8x128xf32, #tpu.memory_space<vmem>>, vector<8x128xf32>
      tpu.vector_store %arg21[%c0_59, %c0_60], %68 {strides = array<i32>} : memref<8x128xf32, #tpu.memory_space<vmem>>, vector<8x128xf32>,
    } else {
    }
    return
  }
  func.func @transform_0(%arg0: i32) -> (i32, i32) {
    %c0_i32 = arith.constant 0 : i32
    %c0_i32_0 = arith.constant 0 : i32
    return %arg0, %c0_i32 : i32, i32
  }
  func.func @transform_1(%arg0: i32) -> (i32, i32) {
    %c0_i32 = arith.constant 0 : i32
    %c0_i32_0 = arith.constant 0 : i32
    %c0_i32_1 = arith.constant 0 : i32
    return %c0_i32, %c0_i32_0 : i32, i32
  }
  func.func @transform_2(%arg0: i32) -> (i32, i32) {
    %c0_i32 = arith.constant 0 : i32
    %c0_i32_0 = arith.constant 0 : i32
    %c0_i32_1 = arith.constant 0 : i32
    return %c0_i32, %c0_i32_0 : i32, i32
  }
  func.func @transform_3(%arg0: i32) -> (i32, i32) {
    %c0_i32 = arith.constant 0 : i32
    %c0_i32_0 = arith.constant 0 : i32
    %c0_i32_1 = arith.constant 0 : i32
    return %c0_i32, %c0_i32_0 : i32, i32
  }
  func.func @transform_4(%arg0: i32) -> (i32, i32) {
    %c0_i32 = arith.constant 0 : i32
    %c0_i32_0 = arith.constant 0 : i32
    %c0_i32_1 = arith.constant 0 : i32
    return %c0_i32, %c0_i32_0 : i32, i32
  }
  func.func @transform_5(%arg0: i32) -> (i32, i32) {
    %c0_i32 = arith.constant 0 : i32
    %c0_i32_0 = arith.constant 0 : i32
    %c0_i32_1 = arith.constant 0 : i32
    return %c0_i32, %c0_i32_0 : i32, i32
  }
  func.func @transform_6(%arg0: i32) -> (i32, i32) {
    %c0_i32 = arith.constant 0 : i32
    %c0_i32_0 = arith.constant 0 : i32
    %c0_i32_1 = arith.constant 0 : i32
    return %c0_i32, %c0_i32_0 : i32, i32
  }
  func.func @transform_7(%arg0: i32) -> (i32, i32) {
    %c0_i32 = arith.constant 0 : i32
    %c0_i32_0 = arith.constant 0 : i32
    %c0_i32_1 = arith.constant 0 : i32
    return %c0_i32, %c0_i32_0 : i32, i32
  }
  func.func @transform_8(%arg0: i32) -> (i32, i32) {
    %c0_i32 = arith.constant 0 : i32
    %c0_i32_0 = arith.constant 0 : i32
    %c0_i32_1 = arith.constant 0 : i32
    return %c0_i32, %c0_i32_0 : i32, i32
  }
  func.func @transform_9(%arg0: i32) -> (i32, i32) {
    %c0_i32 = arith.constant 0 : i32
    %c0_i32_0 = arith.constant 0 : i32
    %c0_i32_1 = arith.constant 0 : i32
    return %c0_i32, %c0_i32_0 : i32, i32
  }
  func.func @transform_10(%arg0: i32) -> (i32, i32) {
    %c0_i32 = arith.constant 0 : i32
    %c0_i32_0 = arith.constant 0 : i32
    %c0_i32_1 = arith.constant 0 : i32
    return %c0_i32, %c0_i32_0 : i32, i32
  }
  func.func @transform_11(%arg0: i32) -> (i32, i32) {
    %c0_i32 = arith.constant 0 : i32
    %c0_i32_0 = arith.constant 0 : i32
    %c0_i32_1 = arith.constant 0 : i32
    return %c0_i32, %c0_i32_0 : i32, i32
  }
  func.func @transform_12(%arg0: i32) -> (i32, i32) {
    %c0_i32 = arith.constant 0 : i32
    %c0_i32_0 = arith.constant 0 : i32
    %c0_i32_1 = arith.constant 0 : i32
    return %c0_i32, %c0_i32_0 : i32, i32
  }
  func.func @transform_13(%arg0: i32) -> (i32, i32) {
    %c0_i32 = arith.constant 0 : i32
    %c0_i32_0 = arith.constant 0 : i32
    %c0_i32_1 = arith.constant 0 : i32
    return %c0_i32, %c0_i32_0 : i32, i32
  }
  func.func @transform_14(%arg0: i32) -> (i32, i32) {
    %c0_i32 = arith.constant 0 : i32
    %c0_i32_0 = arith.constant 0 : i32
    %c0_i32_1 = arith.constant 0 : i32
    return %c0_i32, %c0_i32_0 : i32, i32
  }
  func.func @transform_15(%arg0: i32) -> (i32, i32) {
    %c0_i32 = arith.constant 0 : i32
    %c0_i32_0 = arith.constant 0 : i32
    %c0_i32_1 = arith.constant 0 : i32
    return %c0_i32, %c0_i32_0 : i32, i32
  }
  func.func @transform_16(%arg0: i32) -> (i32, i32) {
    %c0_i32 = arith.constant 0 : i32
    %c0_i32_0 = arith.constant 0 : i32
    %c0_i32_1 = arith.constant 0 : i32
    return %c0_i32, %c0_i32_0 : i32, i32
  }
  func.func @transform_17(%arg0: i32) -> (i32, i32) {
    %c0_i32 = arith.constant 0 : i32
    %c0_i32_0 = arith.constant 0 : i32
    %c0_i32_1 = arith.constant 0 : i32
    return %c0_i32, %c0_i32_0 : i32, i32
  }
  func.func @transform_18(%arg0: i32) -> (i32, i32) {
    %c0_i32 = arith.constant 0 : i32
    %c0_i32_0 = arith.constant 0 : i32
    %c0_i32_1 = arith.constant 0 : i32
    return %c0_i32, %c0_i32_0 : i32, i32
  }
  func.func @transform_19(%arg0: i32) -> (i32, i32) {
    %c0_i32 = arith.constant 0 : i32
    %c0_i32_0 = arith.constant 0 : i32
    %c0_i32_1 = arith.constant 0 : i32
    return %c0_i32, %c0_i32_0 : i32, i32
  }
  func.func @transform_20(%arg0: i32) -> (i32, i32) {
    %c0_i32 = arith.constant 0 : i32
    %c0_i32_0 = arith.constant 0 : i32
    %c0_i32_1 = arith.constant 0 : i32
    return %c0_i32, %c0_i32_0 : i32, i32
  }
}

</mosaic_0001>

<bundles_post_ra>
// kernel: forward.1
= control target key start
LH: loop header
LB: loop body
LE: loop exit
PB: predicated region body
PF: predicated region fallthrough
CT: control target
= control target key end

     0   :  { %s4576_s0 = inlined_call_operand.vmem [shape: bf16[128,32], index: 0, kind: input, shape index: {}]   ;;  %s4577_s1 = inlined_call_operand.vmem [shape: bf16[32,128], index: 1, kind: input, shape index: {}]   ;;  %s4578_s2 = inlined_call_operand.vmem [shape: f32[1,128], index: 2, kind: input, shape index: {}]   ;;  %s4579_s3 = inlined_call_operand.vmem [shape: bf16[128,128], index: 3, kind: input, shape index: {}]   ;;  %s4580_s4 = inlined_call_operand.vmem [shape: f32[1,128], index: 4, kind: input, shape index: {}]   ;;  %s4581_s5 = inlined_call_operand.vmem [shape: f32[128,128], index: 5, kind: input, shape index: {}]   ;;  %s4582_s6 = inlined_call_operand.vmem [shape: f32[1,128], index: 6, kind: input, shape index: {}]   ;;  %s4583_s7 = inlined_call_operand.vmem [shape: f32[128,128], index: 7, kind: input, shape index: {}]   ;;  %s4584_s8 = inlined_call_operand.vmem [shape: f32[1,128], index: 8, kind: input, shape index: {}]   ;;  %s4585_s9 = inlined_call_operand.vmem [shape: f32[128,128], index: 9, kind: input, shape index: {}]   ;;  %s4586_s10 = inlined_call_operand.vmem [shape: f32[1,128], index: 10, kind: input, shape index: {}]   ;;  %s4587_s11 = inlined_call_operand.vmem [shape: f32[128,128], index: 11, kind: input, shape index: {}]   ;;  %s4588_s12 = inlined_call_operand.vmem [shape: f32[1,128], index: 12, kind: input, shape index: {}]   ;;  %s4589_s13 = inlined_call_operand.vmem [shape: f32[128,512], index: 13, kind: input, shape index: {}]   ;;  %s4590_s14 = inlined_call_operand.vmem [shape: f32[128,512], index: 14, kind: input, shape index: {}]   ;;  %s4591_s15 = inlined_call_operand.vmem [shape: f32[1,512], index: 15, kind: input, shape index: {}]   ;;  %s4592_s16 = inlined_call_operand.vmem [shape: f32[256,512], index: 16, kind: input, shape index: {}]   ;;  %s4593_s17 = inlined_call_operand.vmem [shape: f32[1,512], index: 17, kind: input, shape index: {}]   ;;  %s4594_s18 = inlined_call_operand.vmem [shape: f32[128,128], index: 18, kind: input, shape index: {}]   ;;  %s4595_s19 = inlined_call_operand.vmem [shape: f32[1,128], index: 19, kind: input, shape index: {}]   ;;  %s4596_s20 = inlined_call_operand.vmem [shape: f32[8,128], index: 20, kind: output, shape index: {}]  }
   0x1   :  { %4599 = sst [smem:[#allocation4_spill]] %s4576_s0 }
   0x2   :  { %4600 = sst [smem:[#allocation5_spill]] %s4577_s1  ;;  %s3411_s1 = smov 0  }
   0x3   :  { %4601 = sst [smem:[#allocation6_spill]] %s4578_s2 }
   0x4   :  { %4602 = sst [smem:[#allocation7_spill]] %s4579_s3 }
   0x5   :  { %4603 = sst [smem:[#allocation8_spill]] %s4580_s4 }
   0x6 LB: > { %s3417_s22 = sadd.s32 4294967295, %s3279_s1   ;;  %p2366_p0 = scmp.ge.s32.totalorder %s3279_s1, 1  ;;  %s3279_s1 = sphi %s3411_s1, %s30_s1  }
   0x7   : > { %p558_p1 = scmp.lt.s32.totalorder %s3279_s1, 3 }
   0x9   : > { %p559_p2 = pnand %p2366_p0, %p558_p1 }
   0xa   : > { %s2367_s23 = sshll.u32 (!%p559_p2), %s3417_s22, 3  ;;  %s4604_s3 = sld [smem:[#allocation4_spill]] (!%p559_p2) }
   0xb   : > { %562 = sbr.rel (%p559_p2) target bundleno = 2380 (0x94c), region = 100  ;;  %p612_p3 = scmp.lt.s32.totalorder (!%p559_p2), %s2367_s23, 15 }
   0xc   : > { %p2369_p4 = scmp.ne.s32.totalorder (!%p559_p2), %s3417_s22, 0 }
  0x12   : > { %s4611_s23 = smov (!%p612_p3, %s2367_s23), 15  ;;  %621 = sbr.rel (%p2369_p4) target bundleno = 25 (0x19), region = 104 }
  0x13   : > { %s2368_s24 = sshll.u32 %s4611_s23, 2  ;;  %v3301_v0 = vmov (!%p2369_p4), -inf  }
  0x14   : > { %s615_s26 = scalar_lea.vmem %s4604_s3, %s2368_s24  ;;  %622 = vst [vmem:[#allocation2] sm:$0xff] (!%p2369_p4), %v3301_v0  ;;  %623 = vst [vmem:[#allocation2 + $0x8] sm:$0xff] (!%p2369_p4), %v3301_v0 }
  0x15   : > { %624 = vst [vmem:[#allocation2 + $0x10] sm:$0xff] (!%p2369_p4), %v3301_v0  ;;  %625 = vst [vmem:[#allocation2 + $0x18] sm:$0xff] (!%p2369_p4), %v3301_v0 }
  0x19 PF: > { %s4605_s4 = sld [smem:[#allocation5_spill]]  ;;  %vm677_vm0 = vcmask 261120   ;;  %v3209_v3 = vld [vmem:[%s615_s26] sm:$0xff]   ;;  %v3210_v4 = vld [vmem:[%s615_s26 + $0x8] sm:$0xff]   ;;  %v3211_v5 = vld [vmem:[%s615_s26 + $0x10] sm:$0xff]   ;;  %s4606_s23 = sld [smem:[#allocation7_spill]] }
  0x1a   : > { %2527 = vmatprep.mubr.msk.bf16.mxu0 %vm677_vm0, %v3209_v3  ;;  %v3212_v9 = vld [vmem:[%s615_s26 + $0x18] sm:$0xff]   ;;  %s4607_s28 = sld [smem:[#allocation6_spill]]  ;;  %s4608_s0 = sld [smem:[#allocation8_spill]] }
  0x1b   : > { %v903_v52 = vld [vmem:[#allocation2] sm:$0xff]  ;;  %v904_v58 = vld [vmem:[#allocation2 + $0x8] sm:$0xff]  ;;  %p2390_p5 = scmp.ne.s32.totalorder %s3417_s22, 1 }
  0x1c   : > { %v905_v50 = vld [vmem:[#allocation2 + $0x10] sm:$0xff]  ;;  %v906_v54 = vld [vmem:[#allocation2 + $0x18] sm:$0xff]  ;;  %s3896_s24 = smov (!%p2390_p5), 0  }
  0x1f   : > { %v3207_v1 = vld [vmem:[%s4605_s4] sm:$0xff]   ;;  %v3208_v2 = vld [vmem:[%s4605_s4 + $0x8] sm:$0xff]   ;;  %v3215_v8 = vld [vmem:[%s4606_s23 + $0x10] sm:$0xff]  }
  0x20   : > { %2523 = vmatprep.subr.bf16.mxu0 %v3207_v1  ;;  %v3213_v6 = vld [vmem:[%s4606_s23] sm:$0xff]   ;;  %v3214_v7 = vld [vmem:[%s4606_s23 + $0x8] sm:$0xff]   ;;  %v3216_v10 = vld [vmem:[%s4606_s23 + $0x18] sm:$0xff]  }
  0x21   : > { %2524 = vmatpush3.bf16.msra.mxu0 %v3207_v1  ;;  %2535 = vmatprep.subr.bf16.mxu1 %v3213_v6  ;;  %v3217_v11 = vld [vmem:[%s4606_s23 + $0x20] sm:$0xff]   ;;  %v3218_v12 = vld [vmem:[%s4606_s23 + $0x28] sm:$0xff]   ;;  %v3219_v13 = vld [vmem:[%s4606_s23 + $0x30] sm:$0xff]  }
  0x22   : > { %2525 = vmatprep.subr.bf16.mxu0 %v3208_v2  ;;  %2536 = vmatpush3.bf16.msra.mxu1 %v3213_v6  ;;  %v3220_v14 = vld [vmem:[%s4606_s23 + $0x38] sm:$0xff]   ;;  %v2370_v15 = vld [vmem:[%s4607_s28] ss:$0 sm:$0xff] }
  0x23   : > { %2537 = vmatprep.subr.bf16.mxu1 %v3214_v7  ;;  %v2381_v46 = vld [vmem:[%s4608_s0] ss:$0 sm:$0xff] }
  0x25   : > { %2526 = vmatpush3.bf16.msra.mxu0 %v3208_v2 }
  0x26   : > { %2538 = vmatpush3.bf16.msra.mxu1 %v3214_v7 }
  0x27   : > { %2539 = vmatprep.subr.bf16.mxu1 %v3215_v8 }
  0x28   : > { %2528 = vmatmul.mubr.msk.bf16.vlgmr.msra.gmra.mrb[0].mxu0 %vm677_vm0, %v3210_v4 }
  0x29   : > { %2531 = vmatprep.mubr.msk.bf16.mxu0 %vm677_vm0, %v3211_v5 }
  0x2a   : > { %2540 = vmatpush3.bf16.msra.mxu1 %v3215_v8 }
  0x2b   : > { %2541 = vmatprep.subr.bf16.mxu1 %v3216_v10 }
  0x2e   : > { %2542 = vmatpush3.bf16.msra.mxu1 %v3216_v10  ;;  %v928_v10 = vld [vmem:[%s4581_s5 + $0x8] sm:$0xff] (!%p2390_p5) }
  0x2f   : > { %2543 = vmatprep.subr.bf16.mxu1 %v3217_v11 }
  0x30   : > { %2532 = vmatmul.mubr.msk.bf16.gmra.mrb[4].mxu0 %vm677_vm0, %v3212_v9  ;;  %v927_v9 = vld [vmem:[%s4581_s5] sm:$0xff] (!%p2390_p5) }
  0x32   : > { %2544 = vmatpush3.bf16.msra.mxu1 %v3217_v11  ;;  %v929_v11 = vld [vmem:[%s4581_s5 + $0x10] sm:$0xff] (!%p2390_p5) }
  0x33   : > { %2545 = vmatprep.subr.bf16.mxu1 %v3218_v12 }
  0x36   : > { %2546 = vmatpush3.bf16.msra.mxu1 %v3218_v12  ;;  %v2746_v12 = vpack.c.bf16 (!%p2390_p5), %v928_v10, %v927_v9  ;;  %v1159_v9 = vld [vmem:[%s4585_s9 + $0x40] sm:$0xff] (!%p2390_p5)  ;;  %v1160_v10 = vld [vmem:[%s4585_s9 + $0x48] sm:$0xff] (!%p2390_p5) }
  0x37   : > { %2547 = vmatprep.subr.bf16.mxu1 %v3219_v13 }
  0x38   : > { %2747 = vmatprep.subr.bf16.mxu0 (!%p2390_p5), %v2746_v12 }
  0x39   : > { %2749 = vmatpush3.bf16.msra.mxu0 (!%p2390_p5), %v2746_v12  ;;  %v1161_v12 = vld [vmem:[%s4585_s9 + $0x50] sm:$0xff] (!%p2390_p5) }
  0x3a   : > { %2548 = vmatpush3.bf16.msra.mxu1 %v3219_v13  ;;  %v930_v13 = vld [vmem:[%s4581_s5 + $0x18] sm:$0xff] (!%p2390_p5) }
  0x3b   : > { %2549 = vmatprep.subr.bf16.mxu1 %v3220_v14 }
  0x3e   : > { %2550 = vmatpush3.bf16.msra.mxu1 %v3220_v14  ;;  %v2750_v14 = vpack.c.bf16 (!%p2390_p5), %v930_v13, %v929_v11  ;;  %v2826_v11 = vpack.c.bf16 (!%p2390_p5), %v1160_v10, %v1159_v9  ;;  %v1162_v13 = vld [vmem:[%s4585_s9 + $0x58] sm:$0xff] (!%p2390_p5) }
  0x3f   : > { %v1374_v9 = vld [vmem:[%s4589_s13 + $0x18] sm:$0xff] (!%p2390_p5) }
  0x40   : > { %2751 = vmatprep.subr.bf16.mxu0 (!%p2390_p5), %v2750_v14 }
  0x41   : > { %2753 = vmatpush3.bf16.msra.mxu0 (!%p2390_p5), %v2750_v14  ;;  %v2830_v14 = vpack.c.bf16 (!%p2390_p5), %v1162_v13, %v1161_v12  ;;  %v1371_v12 = vld [vmem:[%s4589_s13] sm:$0xff] (!%p2390_p5) }
  0x42   : > { %v1375_v13 = vld [vmem:[%s4589_s13 + $0x20] sm:$0xff] (!%p2390_p5) }
  0xfb   : > { %v2529_v16 = vpop.f32.mrb[0].mxu0 }
  0xfc   : > { %v733_v17 = vadd.f32 %v2529_v16, %v2370_v15  ;;  %v724_v18 = vpop.f32.mrb[1].mxu0  ;;  %v932_v16 = vld [vmem:[%s4581_s5 + $0x28] sm:$0xff] (!%p2390_p5) }
  0xfd   : > { %v725_v19 = vadd.f32 %v2370_v15, %v724_v18  ;;  %v2530_v20 = vpop.f32.mrb[2].mxu0 }
  0xfe   : > { %v736_v21 = vadd.f32 %v2530_v20, %v2370_v15  ;;  %v727_v22 = vpop.f32.mrb[3].mxu0  ;;  %v757_v24 = vmax.f32 %v733_v17, 0.0  ;;  %v934_v20 = vld [vmem:[%s4581_s5 + $0x38] sm:$0xff] (!%p2390_p5) }
  0xff   : > { %v728_v23 = vadd.f32 %v2370_v15, %v727_v22  ;;  %v755_v26 = vmax.f32 %v725_v19, 0.0  ;;  %v933_v19 = vld [vmem:[%s4581_s5 + $0x30] sm:$0xff] (!%p2390_p5)  ;;  %v1040_v22 = vld [vmem:[%s4583_s7 + $0x8] sm:$0xff] (!%p2390_p5) }
 0x100   : > { %v758_v25 = vmax.f32 %v736_v21, 0.0  ;;  %v1039_v21 = vld [vmem:[%s4583_s7] sm:$0xff] (!%p2390_p5) }
 0x101   : > { %v756_v27 = vmax.f32 %v728_v23, 0.0  ;;  %v1041_v23 = vld [vmem:[%s4583_s7 + $0x10] sm:$0xff] (!%p2390_p5) }
 0x102   : > { %v764_v28 = vpack.c.bf16 %v758_v25, %v757_v24  ;;  %v1042_v24 = vld [vmem:[%s4583_s7 + $0x18] sm:$0xff] (!%p2390_p5)  ;;  %v2778_v25 = vpack.c.bf16 (!%p2390_p5), %v1040_v22, %v1039_v21 }
 0x103   : > { %v2533_v29 = vpop.f32.mrb[4].mxu0  ;;  %v763_v30 = vpack.c.bf16 %v756_v27, %v755_v26  ;;  %v2782_v26 = vpack.c.bf16 (!%p2390_p5), %v1042_v24, %v1041_v23  ;;  %v2758_v27 = vpack.c.bf16 (!%p2390_p5), %v934_v20, %v933_v19 }
 0x104   : > { %v749_v31 = vadd.f32 %v2533_v29, %v2370_v15  ;;  %v740_v32 = vpop.f32.mrb[5].mxu0  ;;  %v1044_v29 = vld [vmem:[%s4583_s7 + $0x28] sm:$0xff] (!%p2390_p5)  ;;  %2779 = vmatprep.subr.bf16.mxu1 (!%p2390_p5), %v2778_v25 }
 0x105   : > { %v741_v33 = vadd.f32 %v2370_v15, %v740_v32  ;;  %v2534_v34 = vpop.f32.mrb[6].mxu0  ;;  %2551 = vmatprep.mubr.bf16.mxu1 %v763_v30  ;;  %v935_v30 = vld [vmem:[%s4581_s5 + $0x40] sm:$0xff] (!%p2390_p5) }
 0x106   : > { %v752_v35 = vadd.f32 %v2534_v34, %v2370_v15  ;;  %v743_v36 = vpop.f32.mrb[7].mxu0  ;;  %2552 = vmatmul.mubr.bf16.vlgmr.msra.gmra.mrb[0].mxu1 %v764_v28  ;;  %v761_v38 = vmax.f32 %v749_v31, 0.0  ;;  %v1043_v28 = vld [vmem:[%s4583_s7 + $0x20] sm:$0xff] (!%p2390_p5)  ;;  %v936_v31 = vld [vmem:[%s4581_s5 + $0x48] sm:$0xff] (!%p2390_p5)  ;;  %v1045_v34 = vld [vmem:[%s4583_s7 + $0x30] sm:$0xff] (!%p2390_p5) }
 0x107   : > { %v744_v37 = vadd.f32 %v2370_v15, %v743_v36  ;;  %v759_v40 = vmax.f32 %v741_v33, 0.0  ;;  %v931_v15 = vld [vmem:[%s4581_s5 + $0x20] sm:$0xff] (!%p2390_p5)  ;;  %2781 = vmatpush3.bf16.msra.mxu1 (!%p2390_p5), %v2778_v25  ;;  %v2786_v32 = vpack.c.bf16 (!%p2390_p5), %v1044_v29, %v1043_v28  ;;  %v2762_v33 = vpack.c.bf16 (!%p2390_p5), %v936_v31, %v935_v30  ;;  %v937_v36 = vld [vmem:[%s4581_s5 + $0x50] sm:$0xff] (!%p2390_p5) }
 0x108   : > { %v762_v39 = vmax.f32 %v752_v35, 0.0  ;;  %v2754_v17 = vpack.c.bf16 (!%p2390_p5), %v932_v16, %v931_v15  ;;  %2783 = vmatprep.subr.bf16.mxu1 (!%p2390_p5), %v2782_v26  ;;  %v1046_v35 = vld [vmem:[%s4583_s7 + $0x38] sm:$0xff] (!%p2390_p5)  ;;  %v1163_v15 = vld [vmem:[%s4585_s9 + $0x60] sm:$0xff] (!%p2390_p5)  ;;  %v1164_v16 = vld [vmem:[%s4585_s9 + $0x68] sm:$0xff] (!%p2390_p5) }
 0x109   : > { %v760_v41 = vmax.f32 %v744_v37, 0.0  ;;  %v938_v37 = vld [vmem:[%s4581_s5 + $0x58] sm:$0xff] (!%p2390_p5)  ;;  %v1165_v31 = vld [vmem:[%s4585_s9 + $0x70] sm:$0xff] (!%p2390_p5) }
 0x10a   : > { %v766_v42 = vpack.c.bf16 %v762_v39, %v761_v38  ;;  %2755 = vmatprep.subr.bf16.mxu0 (!%p2390_p5), %v2754_v17  ;;  %v2790_v38 = vpack.c.bf16 (!%p2390_p5), %v1046_v35, %v1045_v34  ;;  %v2766_v39 = vpack.c.bf16 (!%p2390_p5), %v938_v37, %v937_v36  ;;  %v1263_v34 = vld [vmem:[%s4587_s11] sm:$0xff] (!%p2390_p5)  ;;  %v1264_v35 = vld [vmem:[%s4587_s11 + $0x8] sm:$0xff] (!%p2390_p5)  ;;  %v1265_v36 = vld [vmem:[%s4587_s11 + $0x10] sm:$0xff] (!%p2390_p5) }
 0x10b   : > { %v765_v43 = vpack.c.bf16 %v760_v41, %v759_v40  ;;  %2757 = vmatpush3.bf16.msra.mxu0 (!%p2390_p5), %v2754_v17  ;;  %2785 = vmatpush3.bf16.msra.mxu1 (!%p2390_p5), %v2782_v26  ;;  %v1047_v40 = vld [vmem:[%s4583_s7 + $0x40] sm:$0xff] (!%p2390_p5)  ;;  %v1048_v41 = vld [vmem:[%s4583_s7 + $0x48] sm:$0xff] (!%p2390_p5)  ;;  %v2834_v17 = vpack.c.bf16 (!%p2390_p5), %v1164_v16, %v1163_v15  ;;  %v2842_v37 = vpack.c.bf16 (!%p2390_p5), %v1264_v35, %v1263_v34 }
 0x10c   : > { %2759 = vmatprep.subr.bf16.mxu0 (!%p2390_p5), %v2758_v27  ;;  %2787 = vmatprep.subr.bf16.mxu1 (!%p2390_p5), %v2786_v32  ;;  %v2876_v15 = vpack.c.bf16 (!%p2390_p5), %v1375_v13, %v1371_v12  ;;  %v1380_v16 = vld [vmem:[%s4589_s13 + $0x48] sm:$0xff] (!%p2390_p5)  ;;  %v1389_v13 = vld [vmem:[%s4589_s13 + $0x90] sm:$0xff] (!%p2390_p5) }
 0x10d   : > { %2555 = vmatprep.mubr.bf16.mxu1 %v765_v43  ;;  %v940_v43 = vld [vmem:[%s4581_s5 + $0x68] sm:$0xff] (!%p2390_p5) }
 0x10e   : > { %2556 = vmatmul.mubr.bf16.gmra.mrb[4].mxu1 %v766_v42  ;;  %v939_v42 = vld [vmem:[%s4581_s5 + $0x60] sm:$0xff] (!%p2390_p5)  ;;  %v1408_v34 = vld [vmem:[%s4589_s13 + $0x128] sm:$0xff] (!%p2390_p5) }
 0x10f   : > { %2761 = vmatpush3.bf16.msra.mxu0 (!%p2390_p5), %v2758_v27  ;;  %2789 = vmatpush3.bf16.msra.mxu1 (!%p2390_p5), %v2786_v32  ;;  %v1166_v32 = vld [vmem:[%s4585_s9 + $0x78] sm:$0xff] (!%p2390_p5) }
 0x110   : > { %2763 = vmatprep.subr.bf16.mxu0 (!%p2390_p5), %v2762_v33  ;;  %2791 = vmatprep.subr.bf16.mxu1 (!%p2390_p5), %v2790_v38 }
 0x113   : > { %2765 = vmatpush3.bf16.msra.mxu0 (!%p2390_p5), %v2762_v33  ;;  %2793 = vmatpush3.bf16.msra.mxu1 (!%p2390_p5), %v2790_v38  ;;  %v2838_v33 = vpack.c.bf16 (!%p2390_p5), %v1166_v32, %v1165_v31  ;;  %v1266_v38 = vld [vmem:[%s4587_s11 + $0x18] sm:$0xff] (!%p2390_p5)  ;;  %v1395_v31 = vld [vmem:[%s4589_s13 + $0xc0] sm:$0xff] (!%p2390_p5) }
 0x114   : > { %2767 = vmatprep.subr.bf16.mxu0 (!%p2390_p5), %v2766_v39  ;;  %v1399_v32 = vld [vmem:[%s4589_s13 + $0xe0] sm:$0xff] (!%p2390_p5) }
 0x115   : > { %v2888_v35 = vpack.c.bf16 (!%p2390_p5), %v1399_v32, %v1395_v31  ;;  %v1413_v31 = vld [vmem:[%s4589_s13 + $0x150] sm:$0xff] (!%p2390_p5) }
 0x116   : > { %v1417_v32 = vld [vmem:[%s4589_s13 + $0x170] sm:$0xff] (!%p2390_p5) }
 0x117   : > { %2769 = vmatpush3.bf16.msra.mxu0 (!%p2390_p5), %v2766_v39  ;;  %v2846_v39 = vpack.c.bf16 (!%p2390_p5), %v1266_v38, %v1265_v36  ;;  %v1407_v38 = vld [vmem:[%s4589_s13 + $0x120] sm:$0xff] (!%p2390_p5) }
 0x1d9   : > { %v2553_v44 = vpop.f32.mrb[0].mxu1 }
 0x1da   : > { %v872_v45 = vpop.f32.mrb[1].mxu1  ;;  %v881_v49 = vadd.f32 %v2553_v44, %v2381_v46  ;;  %v2794_v44 = vpack.c.bf16 (!%p2390_p5), %v1048_v41, %v1047_v40  ;;  %v1267_v40 = vld [vmem:[%s4587_s11 + $0x20] sm:$0xff] (!%p2390_p5)  ;;  %v1268_v41 = vld [vmem:[%s4587_s11 + $0x28] sm:$0xff] (!%p2390_p5) }
 0x1db   : > { %v2554_v47 = vpop.f32.mrb[2].mxu1  ;;  %v873_v51 = vadd.f32 %v2381_v46, %v872_v45  ;;  %v2770_v45 = vpack.c.bf16 (!%p2390_p5), %v940_v43, %v939_v42  ;;  %v2850_v42 = vpack.c.bf16 (!%p2390_p5), %v1268_v41, %v1267_v40  ;;  %v1269_v43 = vld [vmem:[%s4587_s11 + $0x30] sm:$0xff] (!%p2390_p5)  ;;  %v1416_v40 = vld [vmem:[%s4589_s13 + $0x168] sm:$0xff] (!%p2390_p5) }
 0x1dc   : > { %v875_v48 = vpop.f32.mrb[3].mxu1  ;;  %v884_v53 = vadd.f32 %v2554_v47, %v2381_v46  ;;  %v909_v57 = vmax.f32 %v905_v50, %v881_v49  ;;  %v1050_v47 = vld [vmem:[%s4583_s7 + $0x58] sm:$0xff] (!%p2390_p5)  ;;  %2795 = vmatprep.subr.bf16.mxu1 (!%p2390_p5), %v2794_v44 }
 0x1dd   : > { %v876_v55 = vadd.f32 %v2381_v46, %v875_v48  ;;  %v907_v61 = vmax.f32 %v903_v52, %v873_v51  ;;  %v941_v48 = vld [vmem:[%s4581_s5 + $0x70] sm:$0xff] (!%p2390_p5)  ;;  %v942_v49 = vld [vmem:[%s4581_s5 + $0x78] sm:$0xff] (!%p2390_p5)  ;;  %2771 = vmatprep.subr.bf16.mxu0 (!%p2390_p5), %v2770_v45  ;;  %v1051_v52 = vld [vmem:[%s4583_s7 + $0x60] sm:$0xff] (!%p2390_p5)  ;;  %2797 = vmatpush3.bf16.msra.mxu1 (!%p2390_p5), %v2794_v44 }
 0x1de   : > { %v910_v0 = vmax.f32 %v906_v54, %v884_v53  ;;  %v2774_v51 = vpack.c.bf16 (!%p2390_p5), %v942_v49, %v941_v48  ;;  %v1052_v53 = vld [vmem:[%s4583_s7 + $0x68] sm:$0xff] (!%p2390_p5)  ;;  %2773 = vmatpush3.bf16.msra.mxu0 (!%p2390_p5), %v2770_v45  ;;  %v1270_v44 = vld [vmem:[%s4587_s11 + $0x38] sm:$0xff] (!%p2390_p5)  ;;  %v1273_v49 = vld [vmem:[%s4587_s11 + $0x50] sm:$0xff] (!%p2390_p5) }
 0x1df   : > { %v908_v4 = vmax.f32 %v904_v58, %v876_v55  ;;  %v2802_v54 = vpack.c.bf16 (!%p2390_p5), %v1052_v53, %v1051_v52  ;;  %v1053_v58 = vld [vmem:[%s4583_s7 + $0x70] sm:$0xff] (!%p2390_p5)  ;;  %v2854_v45 = vpack.c.bf16 (!%p2390_p5), %v1270_v44, %v1269_v43  ;;  %v1275_v52 = vld [vmem:[%s4587_s11 + $0x60] sm:$0xff] (!%p2390_p5)  ;;  %v1276_v53 = vld [vmem:[%s4587_s11 + $0x68] sm:$0xff] (!%p2390_p5) }
 0x1e0   : > { %2775 = vmatprep.subr.bf16.mxu0 (!%p2390_p5), %v2774_v51  ;;  %v1411_v43 = vld [vmem:[%s4589_s13 + $0x140] sm:$0xff] (!%p2390_p5) }
 0x1e1   : > { %v2557_v56 = vpop.f32.mrb[4].mxu1  ;;  %v1415_v44 = vld [vmem:[%s4589_s13 + $0x160] sm:$0xff] (!%p2390_p5) }
 0x1e2   : > { %v897_v59 = vadd.f32 %v2557_v56, %v2381_v46  ;;  %v888_v60 = vpop.f32.mrb[5].mxu1  ;;  %2777 = vmatpush3.bf16.msra.mxu0 (!%p2390_p5), %v2774_v51 }
 0x1e3   : > { %v889_v62 = vadd.f32 %v2381_v46, %v888_v60  ;;  %v2558_v63 = vpop.f32.mrb[6].mxu1  ;;  %922 = sbr.rel (%p2390_p5) target bundleno = 2380 (0x94c), region = 108 }
 0x1e4   : > { %v913_v1 = vmax.f32 %v909_v57, %v897_v59  ;;  %v900_v2 = vadd.f32 %v2558_v63, %v2381_v46  ;;  %v891_v3 = vpop.f32.mrb[7].mxu1  ;;  %v1054_v59 = vld [vmem:[%s4583_s7 + $0x78] sm:$0xff] (!%p2390_p5)  ;;  %v1153_v63 = vld [vmem:[%s4585_s9 + $0x10] sm:$0xff] (!%p2390_p5) }
 0x1e5   : > { %v911_v5 = vmax.f32 %v907_v61, %v889_v62  ;;  %v892_v6 = vadd.f32 %v2381_v46, %v891_v3  ;;  %v1049_v46 = vld [vmem:[%s4583_s7 + $0x50] sm:$0xff] (!%p2390_p5)  ;;  %v2806_v60 = vpack.c.bf16 (!%p2390_p5), %v1054_v59, %v1053_v58  ;;  %v1151_v61 = vld [vmem:[%s4585_s9] sm:$0xff] (!%p2390_p5)  ;;  %v1152_v62 = vld [vmem:[%s4585_s9 + $0x8] sm:$0xff] (!%p2390_p5) }
 0x1e6   : > { %917 = vst [vmem:[#allocation2 + $0x10] sm:$0xff] %v913_v1  ;;  %v914_v7 = vmax.f32 %v910_v0, %v900_v2  ;;  %v2798_v50 = vpack.c.bf16 (!%p2390_p5), %v1050_v47, %v1049_v46  ;;  %v2810_v0 = vpack.c.bf16 (!%p2390_p5), %v1152_v62, %v1151_v61  ;;  %v1154_v1 = vld [vmem:[%s4585_s9 + $0x18] sm:$0xff] (!%p2390_p5)  ;;  %v1155_v3 = vld [vmem:[%s4585_s9 + $0x20] sm:$0xff] (!%p2390_p5)  ;;  %v1272_v47 = vld [vmem:[%s4587_s11 + $0x48] sm:$0xff] (!%p2390_p5) }
 0x1e7   : > { %915 = vst [vmem:[#allocation2] sm:$0xff] %v911_v5  ;;  %v912_v8 = vmax.f32 %v908_v4, %v892_v6  ;;  %v2814_v2 = vpack.c.bf16 (!%p2390_p5), %v1154_v1, %v1153_v63  ;;  %v1156_v4 = vld [vmem:[%s4585_s9 + $0x28] sm:$0xff] (!%p2390_p5)  ;;  %v1157_v6 = vld [vmem:[%s4585_s9 + $0x30] sm:$0xff] (!%p2390_p5)  ;;  %v1271_v46 = vld [vmem:[%s4587_s11 + $0x40] sm:$0xff] (!%p2390_p5) }
 0x1e8   : > { %918 = vst [vmem:[#allocation2 + $0x18] sm:$0xff] %v914_v7  ;;  %2799 = vmatprep.subr.bf16.mxu1 (!%p2390_p5), %v2798_v50  ;;  %2811 = vmatprep.subr.bf16.mxu0 (!%p2390_p5), %v2810_v0  ;;  %v2818_v5 = vpack.c.bf16 (!%p2390_p5), %v1156_v4, %v1155_v3  ;;  %v1158_v7 = vld [vmem:[%s4585_s9 + $0x38] sm:$0xff] (!%p2390_p5)  ;;  %v2858_v48 = vpack.c.bf16 (!%p2390_p5), %v1272_v47, %v1271_v46  ;;  %v1277_v4 = vld [vmem:[%s4587_s11 + $0x70] sm:$0xff] (!%p2390_p5)  ;;  %v1424_v46 = vld [vmem:[%s4589_s13 + $0x1a8] sm:$0xff] (!%p2390_p5) }
 0x1e9   : > { %916 = vst [vmem:[#allocation2 + $0x8] sm:$0xff] %v912_v8  ;;  %2801 = vmatpush3.bf16.msra.mxu1 (!%p2390_p5), %v2798_v50  ;;  %v2822_v8 = vpack.c.bf16 (!%p2390_p5), %v1158_v7, %v1157_v6  ;;  %v1274_v50 = vld [vmem:[%s4587_s11 + $0x58] sm:$0xff] (!%p2390_p5)  ;;  %v1372_v7 = vld [vmem:[%s4589_s13 + $0x8] sm:$0xff] (!%p2390_p5)  ;;  %v2896_v47 = vpack.c.bf16 (!%p2390_p5), %v1415_v44, %v1411_v43 }
 0x1ea   : > { %2803 = vmatprep.subr.bf16.mxu1 %v2802_v54  ;;  %v2862_v51 = vpack.c.bf16 %v1274_v50, %v1273_v49  ;;  %v1419_v49 = vld [vmem:[%s4589_s13 + $0x180] sm:$0xff]  ;;  %v1434_v44 = vld [vmem:[%s4589_s13 + $0x1f8] sm:$0xff] }
 0x1eb   : > { %v1423_v50 = vld [vmem:[%s4589_s13 + $0x1a0] sm:$0xff] }
 0x1ed   : > { %v925_v56 = vld [vmem:[#allocation2 + $0x10] sm:$0xff]  ;;  %2805 = vmatpush3.bf16.msra.mxu1 %v2802_v54  ;;  %v2866_v54 = vpack.c.bf16 %v1276_v53, %v1275_v52  ;;  %v2393_v52 = vld [vmem:[%s4586_s10] ss:$0 sm:$0xff] }
 0x1ee   : > { %v923_v18 = vld [vmem:[#allocation2] sm:$0xff]  ;;  %2807 = vmatprep.subr.bf16.mxu1 %v2806_v60 }
 0x1ef   : > { %2591 = vmatprep.mubr.f32.mxu0 %v923_v18  ;;  %v926_v57 = vld [vmem:[#allocation2 + $0x18] sm:$0xff]  ;;  %v2391_v18 = vld [vmem:[%s4582_s6] ss:$0 sm:$0xff] }
 0x1f0   : > { %v924_v55 = vld [vmem:[#allocation2 + $0x8] sm:$0xff] }
 0x1f1   : > { %2592 = vmatmul.mubr.f32.vlgmr.msra.gmra.mrb[0].mxu0 %v924_v55  ;;  %2809 = vmatpush3.bf16.msra.mxu1 %v2806_v60  ;;  %v2392_v55 = vld [vmem:[%s4584_s8] ss:$0 sm:$0xff] }
 0x1f2   : > { %2594 = vmatprep.mubr.f32.mxu0 %v925_v56  ;;  %2813 = vmatpush3.bf16.msra.mxu0 %v2810_v0 }
 0x1f3   : > { %2815 = vmatprep.subr.bf16.mxu0 %v2814_v2  ;;  %2843 = vmatprep.subr.bf16.mxu1 %v2842_v37 }
 0x1f5   : > { %2595 = vmatmul.mubr.f32.gmra.mrb[2].mxu0 %v926_v57 }
 0x1f6   : > { %2817 = vmatpush3.bf16.msra.mxu0 %v2814_v2 }
 0x1f7   : > { %2819 = vmatprep.subr.bf16.mxu0 %v2818_v5 }
 0x1fa   : > { %2821 = vmatpush3.bf16.msra.mxu0 %v2818_v5  ;;  %v1278_v5 = vld [vmem:[%s4587_s11 + $0x78] sm:$0xff] }
 0x1fb   : > { %2823 = vmatprep.subr.bf16.mxu0 %v2822_v8  ;;  %v2870_v6 = vpack.c.bf16 %v1278_v5, %v1277_v4  ;;  %v1381_v4 = vld [vmem:[%s4589_s13 + $0x50] sm:$0xff] }
 0x1fc   : > { %v1385_v5 = vld [vmem:[%s4589_s13 + $0x70] sm:$0xff] }
 0x1fe   : > { %2825 = vmatpush3.bf16.msra.mxu0 %v2822_v8  ;;  %v1376_v8 = vld [vmem:[%s4589_s13 + $0x28] sm:$0xff] }
 0x1ff   : > { %2827 = vmatprep.subr.bf16.mxu0 %v2826_v11  ;;  %v2874_v10 = vpack.c.bf16 %v1376_v8, %v1372_v7  ;;  %v1390_v7 = vld [vmem:[%s4589_s13 + $0x98] sm:$0xff] }
 0x200   : > { %v1394_v8 = vld [vmem:[%s4589_s13 + $0xb8] sm:$0xff] }
 0x201   : > { %v2914_v12 = vpack.c.bf16 %v1394_v8, %v1390_v7 }
 0x202   : > { %2829 = vmatpush3.bf16.msra.mxu0 %v2826_v11  ;;  %v1378_v11 = vld [vmem:[%s4589_s13 + $0x38] sm:$0xff] }
 0x203   : > { %2831 = vmatprep.subr.bf16.mxu0 %v2830_v14 }
 0x206   : > { %2833 = vmatpush3.bf16.msra.mxu0 %v2830_v14  ;;  %v2906_v14 = vpack.c.bf16 %v1378_v11, %v1374_v9 }
 0x207   : > { %2835 = vmatprep.subr.bf16.mxu0 %v2834_v17 }
 0x20a   : > { %2837 = vmatpush3.bf16.msra.mxu0 %v2834_v17  ;;  %v1384_v17 = vld [vmem:[%s4589_s13 + $0x68] sm:$0xff] }
 0x20b   : > { %2839 = vmatprep.subr.bf16.mxu0 %v2838_v33 }
 0x20e   : > { %2841 = vmatpush3.bf16.msra.mxu0 %v2838_v33  ;;  %v1404_v33 = vld [vmem:[%s4589_s13 + $0x108] sm:$0xff] }
 0x20f   : > { %2875 = vmatprep.subr.bf16.mxu0 %v2874_v10  ;;  %v2890_v36 = vpack.c.bf16 %v1408_v34, %v1404_v33  ;;  %v2912_v10 = vpack.c.bf16 %v1385_v5, %v1381_v4  ;;  %v1422_v33 = vld [vmem:[%s4589_s13 + $0x198] sm:$0xff] }
 0x210   : > { %v1426_v34 = vld [vmem:[%s4589_s13 + $0x1b8] sm:$0xff] }
 0x2c4   : > { %v2593_v19 = vpop.f32.mrb[0].mxu0 }
 0x2c5   : > { %v1022_v20 = vadd.f32 %v2593_v19, %v2391_v18  ;;  %v1016_v21 = vpop.f32.mrb[1].mxu0  ;;  %v1379_v19 = vld [vmem:[%s4589_s13 + $0x40] sm:$0xff] }
 0x2c6   : > { %v1017_v22 = vadd.f32 %v2391_v18, %v1016_v21 }
 0x2c7   : > { %v1036_v25 = vmax.f32 %v1022_v20, 0.0  ;;  %v1383_v20 = vld [vmem:[%s4589_s13 + $0x60] sm:$0xff] }
 0x2c8   : > { %v2596_v23 = vpop.f32.mrb[2].mxu0  ;;  %v1035_v24 = vmax.f32 %v1017_v22, 0.0  ;;  %v2880_v21 = vpack.c.bf16 %v1383_v20, %v1379_v19  ;;  %v1388_v22 = vld [vmem:[%s4589_s13 + $0x88] sm:$0xff]  ;;  %v1397_v19 = vld [vmem:[%s4589_s13 + $0xd0] sm:$0xff] }
 0x2c9   : > { %v1032_v26 = vadd.f32 %v2596_v23, %v2391_v18  ;;  %v1026_v27 = vpop.f32.mrb[3].mxu0  ;;  %v1392_v23 = vld [vmem:[%s4589_s13 + $0xa8] sm:$0xff]  ;;  %v1401_v20 = vld [vmem:[%s4589_s13 + $0xf0] sm:$0xff] }
 0x2ca   : > { %v1027_v28 = vadd.f32 %v2391_v18, %v1026_v27  ;;  %2629 = vmatprep.mubr.f32.mxu1 %v1035_v24  ;;  %v2878_v18 = vpack.c.bf16 %v1384_v17, %v1380_v16  ;;  %v2882_v24 = vpack.c.bf16 %v1392_v23, %v1388_v22  ;;  %v1402_v16 = vld [vmem:[%s4589_s13 + $0xf8] sm:$0xff]  ;;  %v2920_v23 = vpack.c.bf16 %v1401_v20, %v1397_v19 }
 0x2cb   : > { %v1038_v29 = vmax.f32 %v1032_v26, 0.0  ;;  %2630 = vmatmul.mubr.f32.vlgmr.msra.gmra.mrb[0].mxu1 %v1036_v25  ;;  %v1387_v25 = vld [vmem:[%s4589_s13 + $0x80] sm:$0xff]  ;;  %v1410_v22 = vld [vmem:[%s4589_s13 + $0x138] sm:$0xff] }
 0x2cc   : > { %v1037_v30 = vmax.f32 %v1027_v28, 0.0  ;;  %2845 = vmatpush3.bf16.msra.mxu1 %v2842_v37  ;;  %v1391_v26 = vld [vmem:[%s4589_s13 + $0xa0] sm:$0xff]  ;;  %v1396_v28 = vld [vmem:[%s4589_s13 + $0xc8] sm:$0xff] }
 0x2cd   : > { %2847 = vmatprep.subr.bf16.mxu1 %v2846_v39  ;;  %v2884_v27 = vpack.c.bf16 %v1391_v26, %v1387_v25  ;;  %v1403_v37 = vld [vmem:[%s4589_s13 + $0x100] sm:$0xff]  ;;  %v1405_v25 = vld [vmem:[%s4589_s13 + $0x110] sm:$0xff] }
 0x2ce   : > { %2632 = vmatprep.mubr.f32.mxu1 %v1037_v30  ;;  %v2892_v41 = vpack.c.bf16 %v1407_v38, %v1403_v37  ;;  %v1409_v26 = vld [vmem:[%s4589_s13 + $0x130] sm:$0xff] }
 0x2cf   : > { %2633 = vmatmul.mubr.f32.gmra.mrb[2].mxu1 %v1038_v29  ;;  %v1400_v29 = vld [vmem:[%s4589_s13 + $0xe8] sm:$0xff]  ;;  %v1421_v37 = vld [vmem:[%s4589_s13 + $0x190] sm:$0xff] }
 0x2d0   : > { %2849 = vmatpush3.bf16.msra.mxu1 %v2846_v39  ;;  %v2886_v30 = vpack.c.bf16 %v1400_v29, %v1396_v28  ;;  %v1412_v39 = vld [vmem:[%s4589_s13 + $0x148] sm:$0xff]  ;;  %v1418_v28 = vld [vmem:[%s4589_s13 + $0x178] sm:$0xff]  ;;  %v2924_v29 = vpack.c.bf16 %v1409_v26, %v1405_v25  ;;  %v1425_v38 = vld [vmem:[%s4589_s13 + $0x1b0] sm:$0xff] }
 0x2d1   : > { %2851 = vmatprep.subr.bf16.mxu1 %v2850_v42 }
 0x2d4   : > { %2853 = vmatpush3.bf16.msra.mxu1 %v2850_v42  ;;  %v2894_v42 = vpack.c.bf16 %v1416_v40, %v1412_v39  ;;  %v2932_v39 = vpack.c.bf16 %v1425_v38, %v1421_v37  ;;  %v1428_v40 = vld [vmem:[%s4589_s13 + $0x1c8] sm:$0xff] }
 0x2d5   : > { %2855 = vmatprep.subr.bf16.mxu1 %v2854_v45 }
 0x2d8   : > { %2857 = vmatpush3.bf16.msra.mxu1 %v2854_v45  ;;  %v1420_v45 = vld [vmem:[%s4589_s13 + $0x188] sm:$0xff] }
 0x2d9   : > { %2859 = vmatprep.subr.bf16.mxu1 %v2858_v48 }
 0x2dc   : > { %2861 = vmatpush3.bf16.msra.mxu1 %v2858_v48  ;;  %v2898_v48 = vpack.c.bf16 %v1424_v46, %v1420_v45  ;;  %v1427_v45 = vld [vmem:[%s4589_s13 + $0x1c0] sm:$0xff] }
 0x2dd   : > { %2863 = vmatprep.subr.bf16.mxu1 %v2862_v51  ;;  %v1431_v46 = vld [vmem:[%s4589_s13 + $0x1e0] sm:$0xff] }
 0x2e0   : > { %2865 = vmatpush3.bf16.msra.mxu1 %v2862_v51  ;;  %v2900_v51 = vpack.c.bf16 %v1423_v50, %v1419_v49  ;;  %v1429_v49 = vld [vmem:[%s4589_s13 + $0x1d0] sm:$0xff] }
 0x2e1   : > { %2867 = vmatprep.subr.bf16.mxu1 %v2866_v54  ;;  %v1433_v50 = vld [vmem:[%s4589_s13 + $0x1f0] sm:$0xff] }
 0x2e4   : > { %2869 = vmatpush3.bf16.msra.mxu1 %v2866_v54 }
 0x2e5   : > { %2871 = vmatprep.subr.bf16.mxu1 %v2870_v6 }
 0x2e8   : > { %2873 = vmatpush3.bf16.msra.mxu1 %v2870_v6 }
 0x2e9   : > { %2907 = vmatprep.subr.bf16.mxu1 %v2906_v14  ;;  %v1393_v14 = vld [vmem:[%s4589_s13 + $0xb0] sm:$0xff] }
 0x2ea   : > { %v2916_v17 = vpack.c.bf16 %v1393_v14, %v1389_v13 }
 0x39e   : > { %v2631_v56 = vpop.f32.mrb[0].mxu1 }
 0x39f   : > { %v1134_v57 = vadd.f32 %v2631_v56, %v2392_v55  ;;  %v1128_v58 = vpop.f32.mrb[1].mxu1  ;;  %v1373_v56 = vld [vmem:[%s4589_s13 + $0x10] sm:$0xff] }
 0x3a0   : > { %v1129_v59 = vadd.f32 %v2392_v55, %v1128_v58 }
 0x3a1   : > { %v1148_v62 = vmax.f32 %v1134_v57, 0.0  ;;  %v1377_v57 = vld [vmem:[%s4589_s13 + $0x30] sm:$0xff] }
 0x3a2   : > { %v1147_v60 = vmax.f32 %v1129_v59, 0.0  ;;  %v2634_v61 = vpop.f32.mrb[2].mxu1  ;;  %v1382_v59 = vld [vmem:[%s4589_s13 + $0x58] sm:$0xff] }
 0x3a3   : > { %v1144_v63 = vadd.f32 %v2634_v61, %v2392_v55  ;;  %v1138_v0 = vpop.f32.mrb[3].mxu1 }
 0x3a4   : > { %v1139_v1 = vadd.f32 %v2392_v55, %v1138_v0  ;;  %2667 = vmatprep.mubr.f32.mxu0 %v1147_v60  ;;  %v1386_v60 = vld [vmem:[%s4589_s13 + $0x78] sm:$0xff] }
 0x3a5   : > { %v1150_v2 = vmax.f32 %v1144_v63, 0.0  ;;  %2668 = vmatmul.mubr.f32.vlgmr.msra.gmra.mrb[4].mxu0 %v1148_v62  ;;  %v2908_v63 = vpack.c.bf16 %v1377_v57, %v1373_v56 }
 0x3a6   : > { %v1149_v3 = vmax.f32 %v1139_v1, 0.0  ;;  %2877 = vmatpush1.bf16.msra.mxu0 %v2876_v15  ;;  %v1398_v15 = vld [vmem:[%s4589_s13 + $0xd8] sm:$0xff] }
 0x3a7   : > { %2879 = vmatprep.subr.bf16.mxu0 %v2878_v18  ;;  %v2918_v18 = vpack.c.bf16 %v1402_v16, %v1398_v15 }
 0x3a8   : > { %2670 = vmatprep.mubr.f32.mxu0 %v1149_v3  ;;  %v2910_v3 = vpack.c.bf16 %v1386_v60, %v1382_v59 }
 0x3a9   : > { %2671 = vmatmul.mubr.f32.gmra.mrb[6].mxu0 %v1150_v2 }
 0x3aa   : > { %2881 = vmatpush1.bf16.msra.mxu0 %v2880_v21  ;;  %v1406_v21 = vld [vmem:[%s4589_s13 + $0x118] sm:$0xff] }
 0x3ab   : > { %2883 = vmatprep.subr.bf16.mxu0 %v2882_v24  ;;  %v2922_v24 = vpack.c.bf16 %v1410_v22, %v1406_v21 }
 0x3ae   : > { %2885 = vmatpush1.bf16.msra.mxu0 %v2884_v27  ;;  %v1414_v27 = vld [vmem:[%s4589_s13 + $0x158] sm:$0xff] }
 0x3af   : > { %2887 = vmatprep.subr.bf16.mxu0 %v2886_v30  ;;  %v2926_v30 = vpack.c.bf16 %v1418_v28, %v1414_v27 }
 0x3b2   : > { %2889 = vmatpush1.bf16.msra.mxu0 %v2888_v35  ;;  %v2928_v35 = vpack.c.bf16 %v1417_v32, %v1413_v31 }
 0x3b3   : > { %2891 = vmatprep.subr.bf16.mxu0 %v2890_v36  ;;  %v2930_v36 = vpack.c.bf16 %v1426_v34, %v1422_v33 }
 0x3b6   : > { %2893 = vmatpush1.bf16.msra.mxu0 %v2892_v41  ;;  %v1432_v41 = vld [vmem:[%s4589_s13 + $0x1e8] sm:$0xff] }
 0x3b7   : > { %2895 = vmatprep.subr.bf16.mxu0 %v2894_v42  ;;  %v1430_v42 = vld [vmem:[%s4589_s13 + $0x1d8] sm:$0xff]  ;;  %v2902_v43 = vpack.c.bf16 %v1432_v41, %v1428_v40  ;;  %v3888_v41 = vmov 0.0  }
 0x3ba   : > { %2897 = vmatpush1.bf16.msra.mxu0 %v2896_v47  ;;  %v2934_v47 = vpack.c.bf16 %v1434_v44, %v1430_v42  ;;  %v3890_v42 = vmov 0.0   ;;  %v3894_v44 = vmov 0.0  }
 0x3bb   : > { %2899 = vmatprep.subr.bf16.mxu0 %v2898_v48  ;;  %v2904_v48 = vpack.c.bf16 %v1431_v46, %v1427_v45 }
 0x3be   : > { %2901 = vmatpush1.bf16.msra.mxu0 %v2900_v51  ;;  %v2936_v51 = vpack.c.bf16 %v1433_v50, %v1429_v49 }
 0x3bf   : > { %2903 = vmatprep.subr.bf16.mxu0 %v2902_v43  ;;  %v3892_v43 = vmov 0.0  }
 0x3c2   : > { %2905 = vmatpush1.bf16.msra.mxu0 %v2904_v48 }
 0x478   : > { %v2669_v53 = vpop.f32.mrb[4].mxu0 }
 0x479   : > { %v1246_v54 = vadd.f32 %v2669_v53, %v2393_v52  ;;  %v1240_v55 = vpop.f32.mrb[5].mxu0  ;;  %v2394_v53 = vld [vmem:[%s4588_s12] ss:$0 sm:$0xff] }
 0x47a   : > { %v1241_v58 = vadd.f32 %v2393_v52, %v1240_v55 }
 0x47b   : > { %v1260_v0 = vmax.f32 %v1246_v54, 0.0 }
 0x47c   : > { %v1259_v61 = vmax.f32 %v1241_v58, 0.0  ;;  %v2672_v62 = vpop.f32.mrb[6].mxu0 }
 0x47d   : > { %v1256_v1 = vadd.f32 %v2672_v62, %v2393_v52  ;;  %v1250_v2 = vpop.f32.mrb[7].mxu0  ;;  %v1437_v62 = vlaneseq }
 0x47e   : > { %v1251_v6 = vadd.f32 %v2393_v52, %v1250_v2  ;;  %2705 = vmatprep.mubr.f32.mxu1 %v1259_v61  ;;  %v3302_v52 = vmov 0.0   ;;  %v1435_v2 = vld [vmem:[%s4591_s15] sm:$0xf] }
 0x47f   : > { %2706 = vmatmul.mubr.f32.vlgmr.msra.gmra.mrb[4].mxu1 %v1260_v0  ;;  %v1262_v11 = vmax.f32 %v1256_v1, 0.0  ;;  %1521 = vmatprep.mubr.f32.mxu0 %v3302_v52 }
 0x480   : > { %v1261_v9 = vmax.f32 %v1251_v6, 0.0  ;;  %2909 = vmatpush1.bf16.msra.mxu1 %v2908_v63  ;;  %v3871_v63 = vshrl.u32 %v1437_v62, 7 }
 0x481   : > { %2911 = vmatprep.subr.bf16.mxu1 %v2910_v3 }
 0x482   : > { %2708 = vmatprep.mubr.f32.mxu1 %v1261_v9  ;;  %v1439_v0 = vsub.s32 0, %v3871_v63  ;;  %v1447_v1 = vsub.s32 2, %v3871_v63  ;;  %v1443_v3 = vsub.s32 1, %v3871_v63  ;;  %v1451_v4 = vsub.s32 3, %v3871_v63 }
 0x483   : > { %2709 = vmatmul.mubr.f32.gmra.mrb[6].mxu1 %v1262_v11 }
 0x484   : > { %2913 = vmatpush1.bf16.msra.mxu1 %v2912_v10  ;;  %1610 = vmatprep.mubr.f32.mxu1 %v3302_v52  ;;  %v1440_v5 = vrot.slane %v1435_v2, %v1439_v0  ;;  %v1448_v6 = vrot.slane %v1435_v2, %v1447_v1  ;;  %v1444_v7 = vrot.slane %v1435_v2, %v1443_v3 }
 0x485   : > { %2915 = vmatprep.subr.bf16.mxu1 %v2914_v12  ;;  %v1452_v8 = vrot.slane %v1435_v2, %v1451_v4 }
 0x488   : > { %2917 = vmatpush1.bf16.msra.mxu1 %v2916_v17 }
 0x489   : > { %2919 = vmatprep.subr.bf16.mxu1 %v2918_v18 }
 0x48c   : > { %2921 = vmatpush1.bf16.msra.mxu1 %v2920_v23 }
 0x48d   : > { %2923 = vmatprep.subr.bf16.mxu1 %v2922_v24 }
 0x490   : > { %2925 = vmatpush1.bf16.msra.mxu1 %v2924_v29 }
 0x491   : > { %2927 = vmatprep.subr.bf16.mxu1 %v2926_v30 }
 0x494   : > { %2929 = vmatpush1.bf16.msra.mxu1 %v2928_v35 }
 0x495   : > { %2931 = vmatprep.subr.bf16.mxu1 %v2930_v36 }
 0x498   : > { %2933 = vmatpush1.bf16.msra.mxu1 %v2932_v39 }
 0x499   : > { %2935 = vmatprep.subr.bf16.mxu1 %v2934_v47 }
 0x49c   : > { %2937 = vmatpush1.bf16.msra.mxu1 %v2936_v51 }
 0x552   : > { %v2707_v54 = vpop.f32.mrb[4].mxu1 }
 0x553   : > { %v1352_v55 = vpop.f32.mrb[5].mxu1  ;;  %v1358_v59 = vadd.f32 %v2707_v54, %v2394_v53 }
 0x554   : > { %v1353_v56 = vadd.f32 %v2394_v53, %v1352_v55 }
 0x556   : > { %v2710_v57 = vpop.f32.mrb[6].mxu1  ;;  %1522 = vmatmul.mubr.f32.vlgmr.msra.gmra.mrb[8].mxu0 %v1353_v56  ;;  %1611 = vmatmul.mubr.f32.vlgmr.msra.gmra.mrb[8].mxu1 %v1353_v56 }
 0x557   : > { %v1362_v58 = vpop.f32.mrb[7].mxu1  ;;  %1527 = vmatprep.mubr.f32.mxu0 %v3302_v52  ;;  %1616 = vmatprep.mubr.f32.mxu1 %v3302_v52  ;;  %v1368_v61 = vadd.f32 %v2710_v57, %v2394_v53 }
 0x558   : > { %v1363_v60 = vadd.f32 %v2394_v53, %v1362_v58 }
 0x55a   : > { %1528 = vmatmul.mubr.f32.gmra.mrb[10].mxu0 %v1358_v59  ;;  %1617 = vmatmul.mubr.f32.gmra.mrb[10].mxu1 %v1358_v59 }
 0x55b   : > { %1533 = vmatprep.mubr.f32.mxu0 %v3302_v52  ;;  %1622 = vmatprep.mubr.f32.mxu1 %v3302_v52 }
 0x55e   : > { %1534 = vmatmul.mubr.f32.gmra.mrb[12].mxu0 %v1363_v60  ;;  %1623 = vmatmul.mubr.f32.gmra.mrb[12].mxu1 %v1363_v60 }
 0x55f   : > { %1539 = vmatprep.mubr.f32.mxu0 %v3302_v52  ;;  %1628 = vmatprep.mubr.f32.mxu1 %v3302_v52 }
 0x562   : > { %1540 = vmatmul.mubr.f32.gmra.mrb[14].mxu0 %v1368_v61  ;;  %1629 = vmatmul.mubr.f32.gmra.mrb[14].mxu1 %v1368_v61 }
 0x629   : > { %v1523_v9 = vpop.f32.mrb[8].mxu0  ;;  %v1612_v10 = vpop.f32.mrb[8].mxu1 }
 0x62a   : > { %v1524_v11 = vadd.f32 %v1523_v9, %v1440_v5  ;;  %v1613_v12 = vadd.f32 %v1612_v10, %v1448_v6  ;;  %v1525_v13 = vpop.f32.mrb[9].mxu0  ;;  %v1614_v14 = vpop.f32.mrb[9].mxu1 }
 0x62b   : > { %v1526_v15 = vadd.f32 %v1525_v13, %v1444_v7  ;;  %v1615_v16 = vadd.f32 %v1614_v14, %v1452_v8 }
 0x62c   : > { %1635 = vst [vmem:[#allocation3] sm:$0xff] %v1524_v11  ;;  %1637 = vst [vmem:[#allocation3 + $0x10] sm:$0xff] %v1613_v12 }
 0x62d   : > { %1636 = vst [vmem:[#allocation3 + $0x8] sm:$0xff] %v1526_v15  ;;  %1638 = vst [vmem:[#allocation3 + $0x18] sm:$0xff] %v1615_v16  ;;  %v1529_v17 = vpop.f32.mrb[10].mxu0  ;;  %v1618_v18 = vpop.f32.mrb[10].mxu1 }
 0x62e   : > { %v1530_v19 = vadd.f32 %v1529_v17, %v1440_v5  ;;  %v1619_v20 = vadd.f32 %v1618_v18, %v1448_v6  ;;  %v1531_v21 = vpop.f32.mrb[11].mxu0  ;;  %v1620_v22 = vpop.f32.mrb[11].mxu1 }
 0x62f   : > { %v1532_v23 = vadd.f32 %v1531_v21, %v1444_v7  ;;  %v1621_v24 = vadd.f32 %v1620_v22, %v1452_v8 }
 0x630   : > { %1639 = vst [vmem:[#allocation3 + $0x20] sm:$0xff] %v1530_v19  ;;  %1641 = vst [vmem:[#allocation3 + $0x30] sm:$0xff] %v1619_v20 }
 0x631   : > { %1640 = vst [vmem:[#allocation3 + $0x28] sm:$0xff] %v1532_v23  ;;  %1642 = vst [vmem:[#allocation3 + $0x38] sm:$0xff] %v1621_v24  ;;  %v1535_v25 = vpop.f32.mrb[12].mxu0  ;;  %v1624_v26 = vpop.f32.mrb[12].mxu1 }
 0x632   : > { %v1536_v27 = vadd.f32 %v1535_v25, %v1440_v5  ;;  %v1625_v28 = vadd.f32 %v1624_v26, %v1448_v6  ;;  %v1537_v29 = vpop.f32.mrb[13].mxu0  ;;  %v1626_v30 = vpop.f32.mrb[13].mxu1 }
 0x633   : > { %v1538_v31 = vadd.f32 %v1537_v29, %v1444_v7  ;;  %v1627_v32 = vadd.f32 %v1626_v30, %v1452_v8 }
 0x634   : > { %1643 = vst [vmem:[#allocation3 + $0x40] sm:$0xff] %v1536_v27  ;;  %1645 = vst [vmem:[#allocation3 + $0x50] sm:$0xff] %v1625_v28 }
 0x635   : > { %1644 = vst [vmem:[#allocation3 + $0x48] sm:$0xff] %v1538_v31  ;;  %1646 = vst [vmem:[#allocation3 + $0x58] sm:$0xff] %v1627_v32  ;;  %v1541_v33 = vpop.f32.mrb[14].mxu0  ;;  %v1630_v34 = vpop.f32.mrb[14].mxu1 }
 0x636   : > { %v1542_v35 = vadd.f32 %v1541_v33, %v1440_v5  ;;  %v1631_v36 = vadd.f32 %v1630_v34, %v1448_v6  ;;  %v1543_v37 = vpop.f32.mrb[15].mxu0  ;;  %v1632_v38 = vpop.f32.mrb[15].mxu1 }
 0x637   : > { %v1544_v39 = vadd.f32 %v1543_v37, %v1444_v7  ;;  %v1633_v40 = vadd.f32 %v1632_v38, %v1452_v8 }
 0x638   : > { %1647 = vst [vmem:[#allocation3 + $0x60] sm:$0xff] %v1542_v35  ;;  %1649 = vst [vmem:[#allocation3 + $0x70] sm:$0xff] %v1631_v36 }
 0x639   : > { %1648 = vst [vmem:[#allocation3 + $0x68] sm:$0xff] %v1544_v39  ;;  %1650 = vst [vmem:[#allocation3 + $0x78] sm:$0xff] %v1633_v40 }
 0x63a LB: >> { %v1672_v45 = vld [vmem:[%s4590_s14 + $0x8] sm:$0xff]  ;;  %v1671_v47 = vld [vmem:[%s4590_s14] sm:$0xff]  ;;  %v3303_v53 = vmov 0.0   ;;  %v1674_v6 = vld [vmem:[%s4590_s14 + $0x18] sm:$0xff]  ;;  %s2395_s26 = sshll.u32 %s3299_s24, 3  ;;  %s1656_s24 = sadd.s32 1, %s3299_s24   ;;  %s3299_s24 = sphi %s3896_s24, %s1656_s24   ;;  %v3295_v44 = vphi %v3894_v44, %v1904_v44   ;;  %v3291_v43 = vphi %v3892_v43, %v1902_v43   ;;  %v3287_v42 = vphi %v3890_v42, %v4609_v42   ;;  %v3283_v41 = vphi %v3888_v41, %v2218_v41  }
 0x63b   : >> { %v1676_v46 = vld [vmem:[%s4590_s14 + $0x28] sm:$0xff]  ;;  %v1675_v49 = vld [vmem:[%s4590_s14 + $0x20] sm:$0xff]  ;;  %1799 = vmatprep.mubr.f32.mxu0 %v3303_v53  ;;  %1870 = vmatprep.mubr.f32.mxu1 %v3303_v53  ;;  %v1678_v7 = vld [vmem:[%s4590_s14 + $0x38] sm:$0xff]  ;;  %s1662_s2 = sshra.s32 %s2395_s26, 3  ;;  %p1653_p6 = scmp.ge.s32.totalorder %s1656_s24, 4  }
 0x63c   : >> { %v2938_v48 = vpack.c.bf16 %v1676_v46, %v1672_v45  ;;  %v1680_v50 = vld [vmem:[%s4590_s14 + $0x48] sm:$0xff]  ;;  %v2940_v54 = vpack.c.bf16 %v1675_v49, %v1671_v47  ;;  %v1679_v56 = vld [vmem:[%s4590_s14 + $0x40] sm:$0xff]  ;;  %v2970_v9 = vpack.c.bf16 %v1678_v7, %v1674_v6  ;;  %v1673_v10 = vld [vmem:[%s4590_s14 + $0x10] sm:$0xff]  ;;  %s2407_s25 = sshll.u32 %s1662_s2, 5  ;;  %vm3305_vm1 = vmmov (%p1653_p6), 0  }
 0x63d   : >> { %v1684_v51 = vld [vmem:[%s4590_s14 + $0x68] sm:$0xff]  ;;  %v1683_v57 = vld [vmem:[%s4590_s14 + $0x60] sm:$0xff]  ;;  %v1677_v11 = vld [vmem:[%s4590_s14 + $0x30] sm:$0xff]  ;;  %s1666_s3 = scalar_lea.vmem [#allocation3], %s2407_s25 }
 0x63e   : >> { %v2942_v55 = vpack.c.bf16 %v1684_v51, %v1680_v50  ;;  %v1688_v58 = vld [vmem:[%s4590_s14 + $0x88] sm:$0xff]  ;;  %2939 = vmatprep.subr.bf16.mxu0 %v2938_v48  ;;  %v2944_v60 = vpack.c.bf16 %v1683_v57, %v1679_v56  ;;  %v1687_v61 = vld [vmem:[%s4590_s14 + $0x80] sm:$0xff]  ;;  %v2972_v12 = vpack.c.bf16 %v1677_v11, %v1673_v10  ;;  %2971 = vmatprep.subr.bf16.mxu1 %v2970_v9  ;;  %v1682_v14 = vld [vmem:[%s4590_s14 + $0x58] sm:$0xff] }
 0x63f   : >> { %v1692_v59 = vld [vmem:[%s4590_s14 + $0xa8] sm:$0xff]  ;;  %2941 = vmatpush1.bf16.msra.mxu0 %v2940_v54  ;;  %v1691_v62 = vld [vmem:[%s4590_s14 + $0xa0] sm:$0xff]  ;;  %v1686_v15 = vld [vmem:[%s4590_s14 + $0x78] sm:$0xff] }
 0x640   : >> { %2943 = vmatprep.subr.bf16.mxu0 %v2942_v55  ;;  %v2946_v2 = vpack.c.bf16 %v1692_v59, %v1688_v58  ;;  %v1696_v5 = vld [vmem:[%s4590_s14 + $0xc8] sm:$0xff]  ;;  %v2948_v13 = vpack.c.bf16 %v1691_v62, %v1687_v61  ;;  %v1681_v16 = vld [vmem:[%s4590_s14 + $0x50] sm:$0xff]  ;;  %v1695_v18 = vld [vmem:[%s4590_s14 + $0xc0] sm:$0xff]  ;;  %2973 = vmatpush1.bf16.msra.mxu1 %v2972_v12  ;;  %v2974_v20 = vpack.c.bf16 %v1686_v15, %v1682_v14 }
 0x641   : >> { %v1700_v8 = vld [vmem:[%s4590_s14 + $0xe8] sm:$0xff]  ;;  %v1699_v19 = vld [vmem:[%s4590_s14 + $0xe0] sm:$0xff]  ;;  %v1685_v21 = vld [vmem:[%s4590_s14 + $0x70] sm:$0xff] }
 0x642   : >> { %v2950_v17 = vpack.c.bf16 %v1700_v8, %v1696_v5  ;;  %v1704_v22 = vld [vmem:[%s4590_s14 + $0x108] sm:$0xff]  ;;  %v2976_v24 = vpack.c.bf16 %v1685_v21, %v1681_v16  ;;  %v1690_v25 = vld [vmem:[%s4590_s14 + $0x98] sm:$0xff]  ;;  %2975 = vmatprep.subr.bf16.mxu1 %v2974_v20  ;;  %v1689_v27 = vld [vmem:[%s4590_s14 + $0x90] sm:$0xff]  ;;  %v2952_v29 = vpack.c.bf16 %v1699_v19, %v1695_v18 }
 0x643   : >> { %2945 = vmatpush1.bf16.msra.mxu0 %v2944_v60  ;;  %v1708_v23 = vld [vmem:[%s4590_s14 + $0x128] sm:$0xff]  ;;  %v1694_v26 = vld [vmem:[%s4590_s14 + $0xb8] sm:$0xff]  ;;  %v1693_v28 = vld [vmem:[%s4590_s14 + $0xb0] sm:$0xff] }
 0x644   : >> { %2947 = vmatprep.subr.bf16.mxu0 %v2946_v2  ;;  %v1703_v30 = vld [vmem:[%s4590_s14 + $0x100] sm:$0xff]  ;;  %v2978_v32 = vpack.c.bf16 %v1694_v26, %v1690_v25  ;;  %v2954_v33 = vpack.c.bf16 %v1708_v23, %v1704_v22  ;;  %2977 = vmatpush1.bf16.msra.mxu1 %v2976_v24  ;;  %v1712_v34 = vld [vmem:[%s4590_s14 + $0x148] sm:$0xff]  ;;  %v2980_v35 = vpack.c.bf16 %v1693_v28, %v1689_v27  ;;  %v1698_v36 = vld [vmem:[%s4590_s14 + $0xd8] sm:$0xff] }
 0x645   : >> { %v1707_v31 = vld [vmem:[%s4590_s14 + $0x120] sm:$0xff]  ;;  %v1702_v37 = vld [vmem:[%s4590_s14 + $0xf8] sm:$0xff]  ;;  %v1716_v38 = vld [vmem:[%s4590_s14 + $0x168] sm:$0xff] }
 0x646   : >> { %2979 = vmatprep.subr.bf16.mxu1 %v2978_v32  ;;  %v2982_v39 = vpack.c.bf16 %v1702_v37, %v1698_v36  ;;  %v1697_v40 = vld [vmem:[%s4590_s14 + $0xd0] sm:$0xff]  ;;  %v2956_v46 = vpack.c.bf16 %v1707_v31, %v1703_v30  ;;  %v1706_v47 = vld [vmem:[%s4590_s14 + $0x118] sm:$0xff]  ;;  %v2958_v49 = vpack.c.bf16 %v1716_v38, %v1712_v34  ;;  %v1711_v50 = vld [vmem:[%s4590_s14 + $0x140] sm:$0xff] }
 0x647   : >> { %2949 = vmatpush1.bf16.msra.mxu0 %v2948_v13  ;;  %v1701_v45 = vld [vmem:[%s4590_s14 + $0xf0] sm:$0xff]  ;;  %v1710_v48 = vld [vmem:[%s4590_s14 + $0x138] sm:$0xff]  ;;  %v1715_v51 = vld [vmem:[%s4590_s14 + $0x160] sm:$0xff] }
 0x648   : >> { %2951 = vmatprep.subr.bf16.mxu0 %v2950_v17  ;;  %2981 = vmatpush1.bf16.msra.mxu1 %v2980_v35  ;;  %v1720_v53 = vld [vmem:[%s4590_s14 + $0x188] sm:$0xff]  ;;  %v2984_v54 = vpack.c.bf16 %v1701_v45, %v1697_v40  ;;  %v2986_v56 = vpack.c.bf16 %v1710_v48, %v1706_v47  ;;  %v1705_v57 = vld [vmem:[%s4590_s14 + $0x110] sm:$0xff]  ;;  %v1714_v59 = vld [vmem:[%s4590_s14 + $0x158] sm:$0xff]  ;;  %v2960_v61 = vpack.c.bf16 %v1715_v51, %v1711_v50 }
 0x649   : >> { %v1724_v55 = vld [vmem:[%s4590_s14 + $0x1a8] sm:$0xff]  ;;  %2983 = vmatprep.subr.bf16.mxu1 %v2982_v39  ;;  %v1709_v58 = vld [vmem:[%s4590_s14 + $0x130] sm:$0xff]  ;;  %v1718_v60 = vld [vmem:[%s4590_s14 + $0x178] sm:$0xff] }
 0x64a   : >> { %v2962_v62 = vpack.c.bf16 %v1724_v55, %v1720_v53  ;;  %v1719_v2 = vld [vmem:[%s4590_s14 + $0x180] sm:$0xff]  ;;  %v1728_v6 = vld [vmem:[%s4590_s14 + $0x1c8] sm:$0xff]  ;;  %v2988_v7 = vpack.c.bf16 %v1709_v58, %v1705_v57  ;;  %v2990_v9 = vpack.c.bf16 %v1718_v60, %v1714_v59  ;;  %v1713_v10 = vld [vmem:[%s4590_s14 + $0x150] sm:$0xff] }
 0x64b   : >> { %2953 = vmatpush1.bf16.msra.mxu0 %v2952_v29  ;;  %v1723_v5 = vld [vmem:[%s4590_s14 + $0x1a0] sm:$0xff]  ;;  %v1732_v8 = vld [vmem:[%s4590_s14 + $0x1e8] sm:$0xff]  ;;  %v1717_v11 = vld [vmem:[%s4590_s14 + $0x170] sm:$0xff] }
 0x64c   : >> { %2955 = vmatprep.subr.bf16.mxu0 %v2954_v33  ;;  %2985 = vmatpush1.bf16.msra.mxu1 %v2984_v54  ;;  %v1722_v12 = vld [vmem:[%s4590_s14 + $0x198] sm:$0xff]  ;;  %v2964_v14 = vpack.c.bf16 %v1723_v5, %v1719_v2  ;;  %v2966_v15 = vpack.c.bf16 %v1732_v8, %v1728_v6  ;;  %v1727_v16 = vld [vmem:[%s4590_s14 + $0x1c0] sm:$0xff]  ;;  %v2992_v18 = vpack.c.bf16 %v1717_v11, %v1713_v10  ;;  %v1721_v19 = vld [vmem:[%s4590_s14 + $0x190] sm:$0xff] }
 0x64d   : >> { %2987 = vmatprep.subr.bf16.mxu1 %v2986_v56  ;;  %v1726_v13 = vld [vmem:[%s4590_s14 + $0x1b8] sm:$0xff]  ;;  %v1731_v17 = vld [vmem:[%s4590_s14 + $0x1e0] sm:$0xff]  ;;  %v1725_v21 = vld [vmem:[%s4590_s14 + $0x1b0] sm:$0xff] }
 0x64e   : >> { %v2994_v20 = vpack.c.bf16 %v1726_v13, %v1722_v12  ;;  %v1906_v22 = vld [vmem:[%s4592_s16 + $0x8] sm:$0xff]  ;;  %v1730_v24 = vld [vmem:[%s4590_s14 + $0x1d8] sm:$0xff]  ;;  %v2968_v26 = vpack.c.bf16 %v1731_v17, %v1727_v16  ;;  %v2996_v27 = vpack.c.bf16 %v1725_v21, %v1721_v19  ;;  %v1729_v28 = vld [vmem:[%s4590_s14 + $0x1d0] sm:$0xff] }
 0x64f   : >> { %2957 = vmatpush1.bf16.msra.mxu0 %v2956_v46  ;;  %v1910_v23 = vld [vmem:[%s4592_s16 + $0x28] sm:$0xff]  ;;  %v1734_v25 = vld [vmem:[%s4590_s14 + $0x1f8] sm:$0xff]  ;;  %v1905_v30 = vld [vmem:[%s4592_s16] sm:$0xff] }
 0x650   : >> { %2959 = vmatprep.subr.bf16.mxu0 %v2958_v49  ;;  %2989 = vmatpush1.bf16.msra.mxu1 %v2988_v7  ;;  %v3002_v29 = vpack.c.bf16 %v1910_v23, %v1906_v22  ;;  %v1909_v31 = vld [vmem:[%s4592_s16 + $0x20] sm:$0xff]  ;;  %v2998_v32 = vpack.c.bf16 %v1734_v25, %v1730_v24  ;;  %v1733_v33 = vld [vmem:[%s4590_s14 + $0x1f0] sm:$0xff]  ;;  %v1914_v34 = vld [vmem:[%s4592_s16 + $0x48] sm:$0xff] }
 0x651   : >> { %2991 = vmatprep.subr.bf16.mxu1 %v2990_v9  ;;  %v1918_v35 = vld [vmem:[%s4592_s16 + $0x68] sm:$0xff]  ;;  %v1908_v36 = vld [vmem:[%s4592_s16 + $0x18] sm:$0xff]  ;;  %v3004_v38 = vpack.c.bf16 %v1909_v31, %v1905_v30  ;;  %v3000_v39 = vpack.c.bf16 %v1733_v33, %v1729_v28  ;;  %v1907_v40 = vld [vmem:[%s4592_s16 + $0x10] sm:$0xff] }
 0x652   : >> { %v1912_v37 = vld [vmem:[%s4592_s16 + $0x38] sm:$0xff]  ;;  %v3006_v45 = vpack.c.bf16 %v1918_v35, %v1914_v34  ;;  %v1913_v46 = vld [vmem:[%s4592_s16 + $0x40] sm:$0xff]  ;;  %v1911_v49 = vld [vmem:[%s4592_s16 + $0x30] sm:$0xff] }
 0x653   : >> { %2961 = vmatpush1.bf16.msra.mxu0 %v2960_v61  ;;  %v1917_v47 = vld [vmem:[%s4592_s16 + $0x60] sm:$0xff]  ;;  %v3066_v48 = vpack.c.bf16 %v1912_v37, %v1908_v36  ;;  %v1922_v50 = vld [vmem:[%s4592_s16 + $0x88] sm:$0xff]  ;;  %v1916_v53 = vld [vmem:[%s4592_s16 + $0x58] sm:$0xff]  ;;  %v3068_v56 = vpack.c.bf16 %v1911_v49, %v1907_v40 }
 0x654   : >> { %2963 = vmatprep.subr.bf16.mxu0 %v2962_v62  ;;  %2993 = vmatpush1.bf16.msra.mxu1 %v2992_v18  ;;  %v1926_v51 = vld [vmem:[%s4592_s16 + $0xa8] sm:$0xff]  ;;  %v1920_v54 = vld [vmem:[%s4592_s16 + $0x78] sm:$0xff]  ;;  %v3008_v55 = vpack.c.bf16 %v1917_v47, %v1913_v46  ;;  %v1915_v57 = vld [vmem:[%s4592_s16 + $0x50] sm:$0xff] }
 0x655   : >> { %2995 = vmatprep.subr.bf16.mxu1 %v2994_v20  ;;  %v3010_v58 = vpack.c.bf16 %v1926_v51, %v1922_v50  ;;  %v1921_v59 = vld [vmem:[%s4592_s16 + $0x80] sm:$0xff]  ;;  %v3070_v61 = vpack.c.bf16 %v1920_v54, %v1916_v53  ;;  %v1919_v62 = vld [vmem:[%s4592_s16 + $0x70] sm:$0xff]  ;;  %v1930_v2 = vld [vmem:[%s4592_s16 + $0xc8] sm:$0xff] }
 0x656   : >> { %v1925_v60 = vld [vmem:[%s4592_s16 + $0xa0] sm:$0xff]  ;;  %v1934_v5 = vld [vmem:[%s4592_s16 + $0xe8] sm:$0xff]  ;;  %v1924_v6 = vld [vmem:[%s4592_s16 + $0x98] sm:$0xff]  ;;  %v3072_v9 = vpack.c.bf16 %v1919_v62, %v1915_v57 }
 0x657   : >> { %2965 = vmatpush1.bf16.msra.mxu0 %v2964_v14  ;;  %v1928_v7 = vld [vmem:[%s4592_s16 + $0xb8] sm:$0xff]  ;;  %v3012_v8 = vpack.c.bf16 %v1925_v60, %v1921_v59  ;;  %v1923_v10 = vld [vmem:[%s4592_s16 + $0x90] sm:$0xff]  ;;  %v3014_v11 = vpack.c.bf16 %v1934_v5, %v1930_v2  ;;  %v1929_v12 = vld [vmem:[%s4592_s16 + $0xc0] sm:$0xff] }
 0x658   : >> { %2967 = vmatprep.subr.bf16.mxu0 %v2966_v15  ;;  %2997 = vmatpush1.bf16.msra.mxu1 %v2996_v27  ;;  %v1933_v13 = vld [vmem:[%s4592_s16 + $0xe0] sm:$0xff]  ;;  %v1927_v14 = vld [vmem:[%s4592_s16 + $0xb0] sm:$0xff]  ;;  %v1938_v15 = vld [vmem:[%s4592_s16 + $0x108] sm:$0xff] }
 0x659   : >> { %2999 = vmatprep.subr.bf16.mxu1 %v2998_v32  ;;  %v1942_v16 = vld [vmem:[%s4592_s16 + $0x128] sm:$0xff]  ;;  %v1932_v17 = vld [vmem:[%s4592_s16 + $0xd8] sm:$0xff]  ;;  %v3016_v19 = vpack.c.bf16 %v1933_v13, %v1929_v12  ;;  %v3076_v20 = vpack.c.bf16 %v1927_v14, %v1923_v10  ;;  %v1931_v23 = vld [vmem:[%s4592_s16 + $0xd0] sm:$0xff] }
 0x65a   : >> { %v1936_v18 = vld [vmem:[%s4592_s16 + $0xf8] sm:$0xff]  ;;  %v3018_v21 = vpack.c.bf16 %v1942_v16, %v1938_v15  ;;  %v1935_v24 = vld [vmem:[%s4592_s16 + $0xf0] sm:$0xff]  ;;  %v1941_v30 = vld [vmem:[%s4592_s16 + $0x120] sm:$0xff] }
 0x65b   : >> { %2969 = vmatpush1.bf16.msra.mxu0 %v2968_v26  ;;  %v3078_v22 = vpack.c.bf16 %v1936_v18, %v1932_v17  ;;  %v1940_v25 = vld [vmem:[%s4592_s16 + $0x118] sm:$0xff]  ;;  %v3080_v27 = vpack.c.bf16 %v1935_v24, %v1931_v23  ;;  %v1939_v31 = vld [vmem:[%s4592_s16 + $0x110] sm:$0xff]  ;;  %v1946_v35 = vld [vmem:[%s4592_s16 + $0x148] sm:$0xff] }
 0x65c   : >> { %3003 = vmatprep.subr.bf16.mxu0 %v3002_v29  ;;  %3001 = vmatpush1.bf16.msra.mxu1 %v3000_v39  ;;  %v1944_v26 = vld [vmem:[%s4592_s16 + $0x138] sm:$0xff]  ;;  %v1937_v29 = vld [vmem:[%s4592_s16 + $0x100] sm:$0xff]  ;;  %v1943_v33 = vld [vmem:[%s4592_s16 + $0x130] sm:$0xff] }
 0x65d   : >> { %3067 = vmatprep.subr.bf16.mxu1 %v3066_v48  ;;  %v3082_v28 = vpack.c.bf16 %v1944_v26, %v1940_v25  ;;  %v3020_v32 = vpack.c.bf16 %v1941_v30, %v1937_v29  ;;  %v3084_v34 = vpack.c.bf16 %v1943_v33, %v1939_v31  ;;  %v1950_v36 = vld [vmem:[%s4592_s16 + $0x168] sm:$0xff]  ;;  %v1948_v37 = vld [vmem:[%s4592_s16 + $0x158] sm:$0xff]  ;;  %v1945_v40 = vld [vmem:[%s4592_s16 + $0x140] sm:$0xff] }
 0x65e   : >> { %1800 = vmatmul.mubr.f32.vlgmr.msra.gmra.mrb[0].mxu0 %v3295_v44  ;;  %v1952_v39 = vld [vmem:[%s4592_s16 + $0x178] sm:$0xff]  ;;  %v1949_v46 = vld [vmem:[%s4592_s16 + $0x160] sm:$0xff]  ;;  %v1947_v47 = vld [vmem:[%s4592_s16 + $0x150] sm:$0xff] }
 0x65f   : >> { %3005 = vmatpush1.bf16.msra.mxu0 %v3004_v38  ;;  %1871 = vmatmul.mubr.f32.vlgmr.msra.gmra.mrb[0].mxu1 %v3295_v44  ;;  %v3074_v44 = vpack.c.bf16 %v1928_v7, %v1924_v6  ;;  %v3022_v38 = vpack.c.bf16 %v1950_v36, %v1946_v35  ;;  %v1951_v48 = vld [vmem:[%s4592_s16 + $0x170] sm:$0xff]  ;;  %v3024_v49 = vpack.c.bf16 %v1949_v46, %v1945_v40  ;;  %v1954_v51 = vld [vmem:[%s4592_s16 + $0x188] sm:$0xff]  ;;  %v1956_v54 = vld [vmem:[%s4592_s16 + $0x198] sm:$0xff] }
 0x660   : >> { %3007 = vmatprep.subr.bf16.mxu0 %v3006_v45  ;;  %3069 = vmatpush1.bf16.msra.mxu1 %v3068_v56  ;;  %v3086_v45 = vpack.c.bf16 %v1952_v39, %v1948_v37  ;;  %v3088_v50 = vpack.c.bf16 %v1951_v48, %v1947_v47  ;;  %v1958_v53 = vld [vmem:[%s4592_s16 + $0x1a8] sm:$0xff]  ;;  %v1960_v56 = vld [vmem:[%s4592_s16 + $0x1b8] sm:$0xff]  ;;  %v1953_v57 = vld [vmem:[%s4592_s16 + $0x180] sm:$0xff] }
 0x661   : >> { %3071 = vmatprep.subr.bf16.mxu1 %v3070_v61  ;;  %v3090_v59 = vpack.c.bf16 %v1960_v56, %v1956_v54  ;;  %v1955_v61 = vld [vmem:[%s4592_s16 + $0x190] sm:$0xff]  ;;  %v1962_v5 = vld [vmem:[%s4592_s16 + $0x1c8] sm:$0xff]  ;;  %v1964_v7 = vld [vmem:[%s4592_s16 + $0x1d8] sm:$0xff]  ;;  %2119 = vmatprep.mubr.f32.mxu0 %v3287_v42 }
 0x662   : >> { %v1959_v62 = vld [vmem:[%s4592_s16 + $0x1b0] sm:$0xff]  ;;  %v1966_v6 = vld [vmem:[%s4592_s16 + $0x1e8] sm:$0xff]  ;;  %v1961_v10 = vld [vmem:[%s4592_s16 + $0x1c0] sm:$0xff]  ;;  %2190 = vmatprep.mubr.f32.mxu1 %v3287_v42 }
 0x663   : >> { %3009 = vmatpush1.bf16.msra.mxu0 %v3008_v55  ;;  %v3026_v55 = vpack.c.bf16 %v1958_v53, %v1954_v51  ;;  %v3092_v2 = vpack.c.bf16 %v1959_v62, %v1955_v61  ;;  %v1967_v14 = vld [vmem:[%s4592_s16 + $0x1f0] sm:$0xff]  ;;  %v1970_v16 = vld [vmem:[%s4592_s16 + $0x208] sm:$0xff]  ;;  %v1972_v18 = vld [vmem:[%s4592_s16 + $0x218] sm:$0xff] }
 0x664   : >> { %3011 = vmatprep.subr.bf16.mxu0 %v3010_v58  ;;  %3073 = vmatpush1.bf16.msra.mxu1 %v3072_v9  ;;  %v1957_v58 = vld [vmem:[%s4592_s16 + $0x1a0] sm:$0xff]  ;;  %v1968_v9 = vld [vmem:[%s4592_s16 + $0x1f8] sm:$0xff]  ;;  %v1974_v17 = vld [vmem:[%s4592_s16 + $0x228] sm:$0xff] }
 0x665   : >> { %3075 = vmatprep.subr.bf16.mxu1 %v3074_v44  ;;  %v3028_v60 = vpack.c.bf16 %v1957_v58, %v1953_v57  ;;  %v3094_v12 = vpack.c.bf16 %v1968_v9, %v1964_v7  ;;  %v1963_v44 = vld [vmem:[%s4592_s16 + $0x1d0] sm:$0xff]  ;;  %v1982_v29 = vld [vmem:[%s4592_s16 + $0x268] sm:$0xff]  ;;  %v1980_v30 = vld [vmem:[%s4592_s16 + $0x258] sm:$0xff] }
 0x666   : >> { %v3096_v15 = vpack.c.bf16 %v1967_v14, %v1963_v44  ;;  %v1971_v25 = vld [vmem:[%s4592_s16 + $0x210] sm:$0xff]  ;;  %v1977_v33 = vld [vmem:[%s4592_s16 + $0x240] sm:$0xff]  ;;  %v1986_v40 = vld [vmem:[%s4592_s16 + $0x288] sm:$0xff] }
 0x667   : >> { %3013 = vmatpush1.bf16.msra.mxu0 %v3012_v8  ;;  %v3030_v8 = vpack.c.bf16 %v1966_v6, %v1962_v5  ;;  %v1975_v26 = vld [vmem:[%s4592_s16 + $0x230] sm:$0xff]  ;;  %v1988_v46 = vld [vmem:[%s4592_s16 + $0x298] sm:$0xff]  ;;  %v1994_v57 = vld [vmem:[%s4592_s16 + $0x2c8] sm:$0xff] }
 0x668   : >> { %3015 = vmatprep.subr.bf16.mxu0 %v3014_v11  ;;  %3077 = vmatpush1.bf16.msra.mxu1 %v3076_v20  ;;  %v1965_v11 = vld [vmem:[%s4592_s16 + $0x1e0] sm:$0xff]  ;;  %v1976_v20 = vld [vmem:[%s4592_s16 + $0x238] sm:$0xff]  ;;  %v1979_v37 = vld [vmem:[%s4592_s16 + $0x250] sm:$0xff] }
 0x669   : >> { %3079 = vmatprep.subr.bf16.mxu1 %v3078_v22  ;;  %v3032_v13 = vpack.c.bf16 %v1965_v11, %v1961_v10  ;;  %v1973_v22 = vld [vmem:[%s4592_s16 + $0x220] sm:$0xff]  ;;  %v3098_v23 = vpack.c.bf16 %v1976_v20, %v1972_v18  ;;  %v1992_v48 = vld [vmem:[%s4592_s16 + $0x2b8] sm:$0xff]  ;;  %v1987_v54 = vld [vmem:[%s4592_s16 + $0x290] sm:$0xff] }
 0x66a   : >> { %v3106_v51 = vpack.c.bf16 %v1992_v48, %v1988_v46  ;;  %v1998_v58 = vld [vmem:[%s4592_s16 + $0x2e8] sm:$0xff]  ;;  %v2000_v61 = vld [vmem:[%s4592_s16 + $0x2f8] sm:$0xff]  ;;  %v1993_v62 = vld [vmem:[%s4592_s16 + $0x2c0] sm:$0xff] }
 0x66b   : >> { %3017 = vmatpush1.bf16.msra.mxu0 %v3016_v19  ;;  %v3034_v19 = vpack.c.bf16 %v1974_v17, %v1970_v16  ;;  %v1995_v7 = vld [vmem:[%s4592_s16 + $0x2d0] sm:$0xff]  ;;  %v2002_v10 = vld [vmem:[%s4592_s16 + $0x308] sm:$0xff]  ;;  %v2008_v44 = vld [vmem:[%s4592_s16 + $0x338] sm:$0xff] }
 0x66c   : >> { %3019 = vmatprep.subr.bf16.mxu0 %v3018_v21  ;;  %3081 = vmatpush1.bf16.msra.mxu1 %v3080_v27  ;;  %v1969_v21 = vld [vmem:[%s4592_s16 + $0x200] sm:$0xff]  ;;  %v3100_v27 = vpack.c.bf16 %v1975_v26, %v1971_v25  ;;  %v2006_v11 = vld [vmem:[%s4592_s16 + $0x328] sm:$0xff]  ;;  %v2003_v18 = vld [vmem:[%s4592_s16 + $0x310] sm:$0xff] }
 0x66d   : >> { %3083 = vmatprep.subr.bf16.mxu1 %v3082_v28  ;;  %v3036_v24 = vpack.c.bf16 %v1973_v22, %v1969_v21  ;;  %v1978_v28 = vld [vmem:[%s4592_s16 + $0x248] sm:$0xff]  ;;  %v2001_v14 = vld [vmem:[%s4592_s16 + $0x300] sm:$0xff]  ;;  %v2016_v25 = vld [vmem:[%s4592_s16 + $0x378] sm:$0xff] }
 0x66e   : >> { %v3038_v31 = vpack.c.bf16 %v1982_v29, %v1978_v28  ;;  %v2010_v21 = vld [vmem:[%s4592_s16 + $0x348] sm:$0xff]  ;;  %v2009_v26 = vld [vmem:[%s4592_s16 + $0x340] sm:$0xff] }
 0x66f   : >> { %3021 = vmatpush1.bf16.msra.mxu0 %v3020_v32  ;;  %v1984_v32 = vld [vmem:[%s4592_s16 + $0x278] sm:$0xff]  ;;  %v2014_v22 = vld [vmem:[%s4592_s16 + $0x368] sm:$0xff] }
 0x670   : >> { %3085 = vmatpush1.bf16.msra.mxu1 %v3084_v34  ;;  %3023 = vmatprep.subr.bf16.mxu0 %v3022_v38  ;;  %v1981_v34 = vld [vmem:[%s4592_s16 + $0x260] sm:$0xff]  ;;  %v3102_v35 = vpack.c.bf16 %v1984_v32, %v1980_v30  ;;  %v1983_v38 = vld [vmem:[%s4592_s16 + $0x270] sm:$0xff]  ;;  %v2018_v32 = vld [vmem:[%s4592_s16 + $0x388] sm:$0xff] }
 0x671   : >> { %3087 = vmatprep.subr.bf16.mxu1 %v3086_v45  ;;  %v3040_v36 = vpack.c.bf16 %v1981_v34, %v1977_v33  ;;  %v3104_v39 = vpack.c.bf16 %v1983_v38, %v1979_v37  ;;  %v1990_v45 = vld [vmem:[%s4592_s16 + $0x2a8] sm:$0xff]  ;;  %v2011_v30 = vld [vmem:[%s4592_s16 + $0x350] sm:$0xff] }
 0x672   : >> { %v3042_v47 = vpack.c.bf16 %v1990_v45, %v1986_v40  ;;  %v2022_v34 = vld [vmem:[%s4592_s16 + $0x3a8] sm:$0xff]  ;;  %v2021_v40 = vld [vmem:[%s4592_s16 + $0x3a0] sm:$0xff]  ;;  %v2019_v45 = vld [vmem:[%s4592_s16 + $0x390] sm:$0xff] }
 0x673   : >> { %3025 = vmatpush1.bf16.msra.mxu0 %v3024_v49  ;;  %v1985_v49 = vld [vmem:[%s4592_s16 + $0x280] sm:$0xff]  ;;  %v3058_v37 = vpack.c.bf16 %v2022_v34, %v2018_v32  ;;  %v2026_v48 = vld [vmem:[%s4592_s16 + $0x3c8] sm:$0xff] }
 0x674   : >> { %3089 = vmatpush1.bf16.msra.mxu1 %v3088_v50  ;;  %3027 = vmatprep.subr.bf16.mxu0 %v3026_v55  ;;  %v1989_v50 = vld [vmem:[%s4592_s16 + $0x2a0] sm:$0xff]  ;;  %v1991_v55 = vld [vmem:[%s4592_s16 + $0x2b0] sm:$0xff] }
 0x675   : >> { %3091 = vmatprep.subr.bf16.mxu1 %v3090_v59  ;;  %v3044_v53 = vpack.c.bf16 %v1989_v50, %v1985_v49  ;;  %v3108_v56 = vpack.c.bf16 %v1991_v55, %v1987_v54  ;;  %v1996_v59 = vld [vmem:[%s4592_s16 + $0x2d8] sm:$0xff]  ;;  %v2030_v49 = vld [vmem:[%s4592_s16 + $0x3e8] sm:$0xff]  ;;  %v2025_v55 = vld [vmem:[%s4592_s16 + $0x3c0] sm:$0xff] }
 0x676   : >> { %v3110_v5 = vpack.c.bf16 %v2000_v61, %v1996_v59  ;;  %v2032_v54 = vld [vmem:[%s4592_s16 + $0x3f8] sm:$0xff]  ;;  %v2031_v59 = vld [vmem:[%s4592_s16 + $0x3f0] sm:$0xff] }
 0x677   : >> { %3029 = vmatpush1.bf16.msra.mxu0 %v3028_v60  ;;  %v3046_v60 = vpack.c.bf16 %v1998_v58, %v1994_v57  ;;  %v2029_v57 = vld [vmem:[%s4592_s16 + $0x3e0] sm:$0xff]  ;;  %v2027_v58 = vld [vmem:[%s4592_s16 + $0x3d0] sm:$0xff] }
 0x678   : >> { %3093 = vmatpush1.bf16.msra.mxu1 %v3092_v2  ;;  %3031 = vmatprep.subr.bf16.mxu0 %v3030_v8  ;;  %v1997_v2 = vld [vmem:[%s4592_s16 + $0x2e0] sm:$0xff]  ;;  %v1999_v8 = vld [vmem:[%s4592_s16 + $0x2f0] sm:$0xff]  ;;  %v3128_v61 = vpack.c.bf16 %v2031_v59, %v2027_v58 }
 0x679   : >> { %3095 = vmatprep.subr.bf16.mxu1 %v3094_v12  ;;  %v3048_v6 = vpack.c.bf16 %v1997_v2, %v1993_v62  ;;  %v3112_v9 = vpack.c.bf16 %v1999_v8, %v1995_v7  ;;  %v2004_v12 = vld [vmem:[%s4592_s16 + $0x318] sm:$0xff]  ;;  %v1667_v62 = vld [vmem:[%s1666_s3] sm:$0xff]  ;;  %v1668_v2 = vld [vmem:[%s1666_s3 + $0x8] sm:$0xff] }
 0x67a   : >> { %v3114_v16 = vpack.c.bf16 %v2008_v44, %v2004_v12  ;;  %v1670_v44 = vld [vmem:[%s1666_s3 + $0x18] sm:$0xff] }
 0x67b   : >> { %3033 = vmatpush1.bf16.msra.mxu0 %v3032_v13  ;;  %v3050_v13 = vpack.c.bf16 %v2006_v11, %v2002_v10  ;;  %v1669_v10 = vld [vmem:[%s1666_s3 + $0x10] sm:$0xff] }
 0x67c   : >> { %3097 = vmatpush1.bf16.msra.mxu1 %v3096_v15  ;;  %3035 = vmatprep.subr.bf16.mxu0 %v3034_v19  ;;  %v2005_v15 = vld [vmem:[%s4592_s16 + $0x320] sm:$0xff]  ;;  %v2007_v19 = vld [vmem:[%s4592_s16 + $0x330] sm:$0xff] }
 0x67d   : >> { %3099 = vmatprep.subr.bf16.mxu1 %v3098_v23  ;;  %v3052_v17 = vpack.c.bf16 %v2005_v15, %v2001_v14  ;;  %v3116_v20 = vpack.c.bf16 %v2007_v19, %v2003_v18  ;;  %v2012_v23 = vld [vmem:[%s4592_s16 + $0x358] sm:$0xff] }
 0x67e   : >> { %v3118_v28 = vpack.c.bf16 %v2016_v25, %v2012_v23 }
 0x67f   : >> { %3037 = vmatpush1.bf16.msra.mxu0 %v3036_v24  ;;  %v3054_v24 = vpack.c.bf16 %v2014_v22, %v2010_v21 }
 0x680   : >> { %3101 = vmatpush1.bf16.msra.mxu1 %v3100_v27  ;;  %3039 = vmatprep.subr.bf16.mxu0 %v3038_v31  ;;  %v2013_v27 = vld [vmem:[%s4592_s16 + $0x360] sm:$0xff]  ;;  %v2015_v31 = vld [vmem:[%s4592_s16 + $0x370] sm:$0xff] }
 0x681   : >> { %3103 = vmatprep.subr.bf16.mxu1 %v3102_v35  ;;  %v3056_v29 = vpack.c.bf16 %v2013_v27, %v2009_v26  ;;  %v3120_v33 = vpack.c.bf16 %v2015_v31, %v2011_v30  ;;  %v2020_v35 = vld [vmem:[%s4592_s16 + $0x398] sm:$0xff] }
 0x683   : >> { %3041 = vmatpush1.bf16.msra.mxu0 %v3040_v36  ;;  %v2024_v36 = vld [vmem:[%s4592_s16 + $0x3b8] sm:$0xff] }
 0x684   : >> { %3105 = vmatpush1.bf16.msra.mxu1 %v3104_v39  ;;  %3043 = vmatprep.subr.bf16.mxu0 %v3042_v47  ;;  %v3122_v38 = vpack.c.bf16 %v2024_v36, %v2020_v35  ;;  %v2017_v39 = vld [vmem:[%s4592_s16 + $0x380] sm:$0xff]  ;;  %v2023_v47 = vld [vmem:[%s4592_s16 + $0x3b0] sm:$0xff] }
 0x685   : >> { %3107 = vmatprep.subr.bf16.mxu1 %v3106_v51  ;;  %v3060_v46 = vpack.c.bf16 %v2021_v40, %v2017_v39  ;;  %v3124_v50 = vpack.c.bf16 %v2023_v47, %v2019_v45  ;;  %v3062_v51 = vpack.c.bf16 %v2030_v49, %v2026_v48 }
 0x687   : >> { %3045 = vmatpush1.bf16.msra.mxu0 %v3044_v53  ;;  %v2028_v53 = vld [vmem:[%s4592_s16 + $0x3d8] sm:$0xff] }
 0x688   : >> { %3109 = vmatpush1.bf16.msra.mxu1 %v3108_v56  ;;  %3047 = vmatprep.subr.bf16.mxu0 %v3046_v60  ;;  %v3126_v56 = vpack.c.bf16 %v2032_v54, %v2028_v53  ;;  %v3064_v60 = vpack.c.bf16 %v2029_v57, %v2025_v55 }
 0x689   : >> { %3111 = vmatprep.subr.bf16.mxu1 %v3110_v5 }
 0x68b   : >> { %3049 = vmatpush1.bf16.msra.mxu0 %v3048_v6 }
 0x68c   : >> { %3113 = vmatpush1.bf16.msra.mxu1 %v3112_v9  ;;  %3051 = vmatprep.subr.bf16.mxu0 %v3050_v13 }
 0x68d   : >> { %3115 = vmatprep.subr.bf16.mxu1 %v3114_v16 }
 0x68f   : >> { %3053 = vmatpush1.bf16.msra.mxu0 %v3052_v17 }
 0x690   : >> { %3117 = vmatpush1.bf16.msra.mxu1 %v3116_v20  ;;  %3055 = vmatprep.subr.bf16.mxu0 %v3054_v24 }
 0x691   : >> { %3119 = vmatprep.subr.bf16.mxu1 %v3118_v28 }
 0x693   : >> { %3057 = vmatpush1.bf16.msra.mxu0 %v3056_v29  ;;  %v2033_v29 = vld [vmem:[%s4593_s17] sm:$0xf] }
 0x694   : >> { %3121 = vmatpush1.bf16.msra.mxu1 %v3120_v33  ;;  %3059 = vmatprep.subr.bf16.mxu0 %v3058_v37  ;;  %v2038_v30 = vrot.slane %v2033_v29, %v1439_v0  ;;  %v2042_v31 = vrot.slane %v2033_v29, %v1443_v3  ;;  %v2046_v40 = vrot.slane %v2033_v29, %v1447_v1  ;;  %v2226_v0 = vld [vmem:[%s4594_s18 + $0x20] sm:$0xff] (%p1653_p6)  ;;  %v2227_v1 = vld [vmem:[%s4594_s18 + $0x28] sm:$0xff] (%p1653_p6) }
 0x695   : >> { %3123 = vmatprep.subr.bf16.mxu1 %v3122_v38  ;;  %v2050_v45 = vrot.slane %v2033_v29, %v1451_v4  ;;  %v3137_v3 = vpack.c.bf16 (%p1653_p6), %v2227_v1, %v2226_v0  ;;  %v2228_v4 = vld [vmem:[%s4594_s18 + $0x30] sm:$0xff] (%p1653_p6) }
 0x697   : >> { %3061 = vmatpush1.bf16.msra.mxu0 %v3060_v46 }
 0x698   : >> { %3125 = vmatpush1.bf16.msra.mxu1 %v3124_v50  ;;  %3063 = vmatprep.subr.bf16.mxu0 %v3062_v51 }
 0x699   : >> { %3127 = vmatprep.subr.bf16.mxu1 %v3126_v56 }
 0x69b   : >> { %3065 = vmatpush1.bf16.msra.mxu0 %v3064_v60 }
 0x69c   : >> { %3129 = vmatpush1.bf16.msra.mxu1 %v3128_v61 }
 0x731   : >> { %v1801_v5 = vpop.f32.mrb[0].mxu0 }
 0x732   : >> { %v1877_v6 = vadd.f32 %v1801_v5, %v1667_v62  ;;  %v1803_v7 = vpop.f32.mrb[1].mxu0  ;;  %v1872_v11 = vpop.f32.mrb[0].mxu1  ;;  %v2222_v5 = vld [vmem:[%s4594_s18] sm:$0xff] (%p1653_p6) }
 0x733   : >> { %v1878_v8 = vadd.f32 %v1803_v7, %v1668_v2  ;;  %v1874_v12 = vpop.f32.mrb[1].mxu1  ;;  %v1879_v13 = vadd.f32 %v1872_v11, %v1669_v10  ;;  %v2224_v7 = vld [vmem:[%s4594_s18 + $0x10] sm:$0xff] (%p1653_p6)  ;;  %v2225_v10 = vld [vmem:[%s4594_s18 + $0x18] sm:$0xff] (%p1653_p6) }
 0x734   : >> { %v2398_v9 = vmul.f32 -1.442695, %v1877_v6  ;;  %v1880_v15 = vadd.f32 %v1874_v12, %v1670_v44  ;;  %v2223_v6 = vld [vmem:[%s4594_s18 + $0x8] sm:$0xff] (%p1653_p6)  ;;  %v3134_v63 = vpack.c.bf16 (%p1653_p6), %v2225_v10, %v2224_v7  ;;  %v2232_v12 = vld [vmem:[%s4594_s18 + $0x50] sm:$0xff] (%p1653_p6) }
 0x735   : >> { %v2399_v42 = vmul.f32 -1.442695, %v1878_v8  ;;  %v2400_v14 = vmul.f32 -1.442695, %v1879_v13  ;;  %v3304_v8 = vmov (%p1653_p6), 0.0|0.0   ;;  %v2233_v13 = vld [vmem:[%s4594_s18 + $0x58] sm:$0xff] (%p1653_p6) }
 0x736   : >> { %3221 = vpow2.f32 %v2398_v9  ;;  %3130 = vmatprep.subr.bf16.mxu0 (%p1653_p6), %v3304_v8  ;;  %v3131_v9 = vpack.c.bf16 (%p1653_p6), %v2223_v6, %v2222_v5 }
 0x737   : >> { %3223 = vpow2.f32 %v2399_v42 }
 0x738   : >> { %3225 = vpow2.f32 %v2400_v14  ;;  %v2234_v14 = vld [vmem:[%s4594_s18 + $0x60] sm:$0xff] (%p1653_p6) }
 0x739   : >> { %3227 = vtanh.f32 %v1880_v15  ;;  %v2235_v15 = vld [vmem:[%s4594_s18 + $0x68] sm:$0xff] (%p1653_p6) }
 0x740   : >> { %v3222_v16 = vpop.eup %3221 }
 0x741   : >> { %v3224_v17 = vpop.eup %3223  ;;  %v1890_v18 = vadd.f32 1.0, %v3222_v16  ;;  %v3149_v16 = vpack.c.bf16 (%p1653_p6), %v2235_v15, %v2234_v14 }
 0x742   : >> { %v1891_v19 = vadd.f32 1.0, %v3224_v17  ;;  %v3226_v20 = vpop.eup %3225  ;;  %v2236_v17 = vld [vmem:[%s4594_s18 + $0x70] sm:$0xff] (%p1653_p6) }
 0x743   : >> { %3229 = vrcp.f32 %v1890_v18  ;;  %v3228_v21 = vpop.eup %3227  ;;  %v1892_v23 = vadd.f32 1.0, %v3226_v20  ;;  %v2237_v18 = vld [vmem:[%s4594_s18 + $0x78] sm:$0xff] (%p1653_p6) }
 0x744   : >> { %3231 = vrcp.f32 %v1891_v19  ;;  %v3152_v19 = vpack.c.bf16 (%p1653_p6), %v2237_v18, %v2236_v17 }
 0x745   : >> { %3233 = vrcp.f32 %v1892_v23 }
 0x74d   : >> { %v3230_v22 = vpop.eup %3229 }
 0x74e   : >> { %v3232_v24 = vpop.eup %3231  ;;  %v1901_v25 = vmul.f32 %v3230_v22, %v3228_v21  ;;  %v2404_v21 = vld [vmem:[%s4595_s19] ss:$0 sm:$0xff] (%p1653_p6) }
 0x74f   : >> { %v1900_v26 = vmul.f32 %v3291_v43, %v3232_v24  ;;  %v3234_v27 = vpop.eup %3233 }
 0x751   : >> { %v1902_v43 = vadd.f32 %v1901_v25, %v1900_v26  }
 0x753   : >> { %3235 = vtanh.f32 %v1902_v43  ;;  %v2230_v43 = vld [vmem:[%s4594_s18 + $0x40] sm:$0xff] (%p1653_p6) }
 0x75d   : >> { %v3236_v28 = vpop.eup %3235 }
 0x75e   : >> { %v1904_v44 = vmul.f32 %v3236_v28, %v3234_v27  }
 0x760   : >> { %2120 = vmatmul.mubr.f32.vlgmr.msra.gmra.mrb[2].mxu0 %v1904_v44  ;;  %2191 = vmatmul.mubr.f32.vlgmr.msra.gmra.mrb[2].mxu1 %v1904_v44  ;;  %v3146_v44 = vpack.c.bf16 (%p1653_p6), %v2233_v13, %v2232_v12 }
 0x761   : > { %2743 = vmatprep.mubr.msk.f32.mxu0 (%p1653_p6), %vm3305_vm1, %v3302_v52  ;;  %3132 = vmatpush3.bf16.msra.mxu0 (%p1653_p6), %v3131_v9  ;;  %v2229_v52 = vld [vmem:[%s4594_s18 + $0x38] sm:$0xff] (%p1653_p6) }
 0x762   : > { %3133 = vmatprep.subr.bf16.mxu0 (%p1653_p6), %v3304_v8 }
 0x765   : > { %3135 = vmatpush3.bf16.msra.mxu0 (%p1653_p6), %v3134_v63 }
 0x766   : > { %3136 = vmatprep.subr.bf16.mxu0 (%p1653_p6), %v3304_v8 }
 0x769   : > { %3138 = vmatpush3.bf16.msra.mxu0 (%p1653_p6), %v3137_v3 }
 0x76a   : > { %3139 = vmatprep.subr.bf16.mxu0 (%p1653_p6), %v3304_v8 }
 0x833   : >> { %v2121_v32 = vpop.f32.mrb[2].mxu0  ;;  %v2192_v33 = vpop.f32.mrb[2].mxu1 }
 0x834   : >> { %v2122_v34 = vadd.f32 %v2121_v32, %v2038_v30  ;;  %v2123_v35 = vpop.f32.mrb[3].mxu0  ;;  %v2194_v36 = vpop.f32.mrb[3].mxu1  ;;  %v2193_v46 = vadd.f32 %v2192_v33, %v2046_v40 }
 0x835   : >> { %v2124_v37 = vadd.f32 %v2123_v35, %v2042_v31  ;;  %v2195_v47 = vadd.f32 %v2194_v36, %v2050_v45 }
 0x836   : >> { %v2401_v38 = vmul.f32 -1.442695, %v2122_v34  ;;  %v2403_v48 = vmul.f32 -1.442695, %v2193_v46 }
 0x837   : >> { %v2402_v39 = vmul.f32 -1.442695, %v2124_v37 }
 0x838   : >> { %3237 = vpow2.f32 %v2401_v38 }
 0x839   : >> { %3239 = vpow2.f32 %v2402_v39 }
 0x83a   : >> { %3241 = vtanh.f32 %v2195_v47 }
 0x83b   : >> { %3243 = vpow2.f32 %v2403_v48 }
 0x842   : >> { %v3238_v49 = vpop.eup %3237 }
 0x843   : >> { %v2206_v50 = vadd.f32 1.0, %v3238_v49  ;;  %v3240_v51 = vpop.eup %3239 }
 0x844   : >> { %v2207_v53 = vadd.f32 1.0, %v3240_v51  ;;  %v3242_v54 = vpop.eup %3241 }
 0x845   : >> { %3245 = vrcp.f32 %v2206_v50  ;;  %v3244_v55 = vpop.eup %3243 }
 0x846   : >> { %3247 = vrcp.f32 %v2207_v53  ;;  %v2208_v59 = vadd.f32 1.0, %v3244_v55 }
 0x848   : >> { %3249 = vrcp.f32 %v2208_v59 }
 0x84f   : >> { %v3246_v56 = vpop.eup %3245 }
 0x850   : >> { %v2217_v57 = vmul.f32 %v3246_v56, %v3242_v54  ;;  %v3248_v58 = vpop.eup %3247 }
 0x851   : >> { %v2216_v60 = vmul.f32 %v3283_v41, %v3248_v58 }
 0x852   : >> { %v3250_v61 = vpop.eup %3249 }
 0x853   : >> { %v2218_v41 = vadd.f32 %v2217_v57, %v2216_v60  }
 0x855   : >> { %3251 = vtanh.f32 %v2218_v41  ;;  %v3140_v41 = vpack.c.bf16 (%p1653_p6), %v2229_v52, %v2228_v4 }
 0x857   : > { %3141 = vmatpush3.bf16.msra.mxu0 (%p1653_p6), %v3140_v41 }
 0x858   : > { %3142 = vmatprep.subr.bf16.mxu0 (%p1653_p6), %v3304_v8 }
 0x85c   : > { %1655 = sbr.rel (!%p1653_p6) target bundleno = 1594 (0x63a), region = 142 }
 0x85f   : >> { %v3252_v62 = vpop.eup %3251 }
 0x860   : >> { %v2220_v2 = vmul.f32 %v3252_v62, %v3250_v61  }
 0x862   : >> { %v4609_v42 = vmov %v2220_v2  ;;  %v2221_v20 = vmax.f32 (%p1653_p6), %v2220_v2, 0.0 }
 0x863   : > { %v2231_v42 = vld [vmem:[%s4594_s18 + $0x48] sm:$0xff] }
 0x864   : > { %v3143_v11 = vpack.c.bf16 %v2231_v42, %v2230_v43 }
 0x866   : > { %3144 = vmatpush3.bf16.msra.mxu0 %v3143_v11 }
 0x867   : > { %3145 = vmatprep.subr.bf16.mxu0 %v3304_v8 }
 0x86a   : > { %3147 = vmatpush3.bf16.msra.mxu0 %v3146_v44 }
 0x86b   : > { %3148 = vmatprep.subr.bf16.mxu0 %v3304_v8 }
 0x86e   : > { %3150 = vmatpush3.bf16.msra.mxu0 %v3149_v16 }
 0x86f   : > { %3151 = vmatprep.subr.bf16.mxu0 %v3304_v8 }
 0x872   : > { %3153 = vmatpush3.bf16.msra.mxu0 %v3152_v19 }
 0x875   : > { %2744 = vmatmul.mubr.f32.vlgmr.msra.gmra.mrb[0].mxu0 %v2221_v20 }
 0x948   : > { %v2311_v22 = vpop.f32.mrb[0].mxu0 }
 0x949   : > { %v2312_v23 = vadd.f32 %v2404_v21, %v2311_v22  ;;  %v2745_v24 = vpop.f32.mrb[1].mxu0 }
 0x94b   : > { %2315 = vst [vmem:[%s4596_s20] sm:$0xff] %v2312_v23 }
 0x94c PF: > { %s30_s1 = sadd.s32 1, %s3279_s1  }
 0x94d   : > { %p27_p7 = scmp.ge.s32.totalorder %s30_s1, 4  }
 0x94f   :  { %29 = sbr.rel (!%p27_p7) target bundleno = 6 (0x6), region = 153 }

</bundles_post_ra>
